<compile_context>
chip_gen: v7x
topology: tpu7x:2x2x1
jax: 0.10.0
libtpu: 0.0.40
codegen_flags: <defaults>
</compile_context>

<pallas_src>
import jax
import jax.numpy as jnp
from jax.experimental import pallas as pl
from jax.experimental.pallas import tpu as pltpu

NUM_LAYERS = 2   # matches num_hidden_layers in the PyTorch spec
LANE = 128


def _round_up(x, m):
    return (x + m - 1) // m * m


def _bf16(x):
    return x.astype(jnp.bfloat16)


def _resident_spec(arr):
    """Full-array block with a constant index_map: DMA'd once, stays in VMEM."""
    ndim = arr.ndim
    return pl.BlockSpec(arr.shape, lambda *_: (0,) * ndim)


# --------------------------------------------------------------------------
# In-kernel helpers
# --------------------------------------------------------------------------

def _gates_to_state(gates, c_prev):
    """PyTorch LSTM cell: gate order (i, f, g, o); elementwise math in f32."""
    h = c_prev.shape[-1]
    i_g = jax.nn.sigmoid(gates[:, 0 * h:1 * h])
    f_g = jax.nn.sigmoid(gates[:, 1 * h:2 * h])
    g_g = jnp.tanh(gates[:, 2 * h:3 * h])
    o_g = jax.nn.sigmoid(gates[:, 3 * h:4 * h])
    c_new = f_g * c_prev + i_g * g_g
    h_new = o_g * jnp.tanh(c_new)
    return h_new, c_new


# --------------------------------------------------------------------------
# Pallas kernels
# --------------------------------------------------------------------------

def _linear_kernel(x_ref, w_ref, b_ref, o_ref):
    """out = x @ W (pre-transposed) + b, f32 accumulate."""
    o_ref[...] = (jnp.dot(x_ref[...], w_ref[...],
                          preferred_element_type=jnp.float32) + b_ref[...])


def _encoder_kernel(xp0_ref, whh0_ref, wih1_ref, whh1_ref, b1_ref,
                    h_ref, c_ref):
    """One time step of the 2-layer encoder LSTM.

    h_ref / c_ref are (L, B, H) outputs with constant index_map -> they stay
    resident in VMEM across the whole time grid and act as the recurrent carry.
    The layer-0 input projection (x @ W_ih0 + b0) is precomputed per step (xp0).
    """
    t = pl.program_id(0)

    @pl.when(t == 0)
    def _init():
        h_ref[...] = jnp.zeros_like(h_ref)
        c_ref[...] = jnp.zeros_like(c_ref)

    # ----- layer 0 -----
    gates0 = xp0_ref[0] + jnp.dot(_bf16(h_ref[0]), whh0_ref[...],
                                  preferred_element_type=jnp.float32)
    h0, c0 = _gates_to_state(gates0, c_ref[0])

    # ----- layer 1 (inter-layer dropout: eval mode == identity) -----
    gates1 = (jnp.dot(_bf16(h0), wih1_ref[...],
                      preferred_element_type=jnp.float32)
              + jnp.dot(_bf16(h_ref[1]), whh1_ref[...],
                        preferred_element_type=jnp.float32)
              + b1_ref[...])
    h1, c1 = _gates_to_state(gates1, c_ref[1])

    h_ref[0] = h0
    h_ref[1] = h1
    c_ref[0] = c0
    c_ref[1] = c1


def _decoder_kernel(tf_ref, emb_ref,
                    wih0_ref, whh0_ref, b0_ref,
                    wih1_ref, whh1_ref, b1_ref,
                    ow_ref, ob_ref, tgt_oh_ref,
                    h_init_ref, c_init_ref,
                    out_ref,
                    h_scr, c_scr, tok_scr):
    """One decode step (token_index = i + 1) of the fused decoder loop.

    Carries: h_scr/c_scr (L,B,H) f32 and tok_scr (B,Vpad) bf16 one-hot of the
    current decoder input token. Embedding lookup is a one-hot matmul; greedy
    argmax and teacher-forcing selection happen in-kernel.
    """
    i = pl.program_id(0)

    @pl.when(i == 0)
    def _init():
        h_scr[...] = h_init_ref[...]
        c_scr[...] = c_init_ref[...]
        tok_scr[...] = tgt_oh_ref[0]          # decoder_input = target[0]

    # embedding lookup (dropout on embedding: eval-mode identity)
    x = _bf16(jnp.dot(tok_scr[...], emb_ref[...],
                      preferred_element_type=jnp.float32))           # (B, E)

    # ----- layer 0 -----
    gates0 = (jnp.dot(x, wih0_ref[...], preferred_element_type=jnp.float32)
              + jnp.dot(_bf16(h_scr[0]), whh0_ref[...],
                        preferred_element_type=jnp.float32)
              + b0_ref[...])
    h0, c0 = _gates_to_state(gates0, c_scr[0])

    # ----- layer 1 -----
    gates1 = (jnp.dot(_bf16(h0), wih1_ref[...],
                      preferred_element_type=jnp.float32)
              + jnp.dot(_bf16(h_scr[1]), whh1_ref[...],
                        preferred_element_type=jnp.float32)
              + b1_ref[...])
    h1, c1 = _gates_to_state(gates1, c_scr[1])

    h_scr[0] = h0
    h_scr[1] = h1
    c_scr[0] = c0
    c_scr[1] = c1

    # ----- output head (lane-dense padded vocab; padded cols biased to -1e9) -----
    logits = (jnp.dot(_bf16(h1), ow_ref[...],
                      preferred_element_type=jnp.float32) + ob_ref[...])  # (B, Vpad)
    out_ref[0] = logits

    # greedy argmax (first occurrence) as a one-hot, fully vectorized
    col = jax.lax.broadcasted_iota(jnp.int32, logits.shape, 1)
    mx = jnp.max(logits, axis=-1, keepdims=True)
    first = jnp.min(jnp.where(logits == mx, col, logits.shape[-1]),
                    axis=-1, keepdims=True)
    greedy_oh = (col == first).astype(jnp.bfloat16)

    # teacher forcing: one Bernoulli draw per step shared by the whole batch
    use_tf = tf_ref[i] > 0
    tok_scr[...] = jnp.where(use_tf, tgt_oh_ref[i + 1], greedy_oh)


# --------------------------------------------------------------------------
# Pallas wrappers
# --------------------------------------------------------------------------

_VMEM = pl.BlockSpec(memory_space=pltpu.MemorySpace.VMEM)


def pallas_linear(x, w_t, b):
    m = x.shape[0]
    n = w_t.shape[1]
    return pl.pallas_call(
        _linear_kernel,
        out_shape=jax.ShapeDtypeStruct((m, n), jnp.float32),
        in_specs=[_VMEM, _VMEM, _VMEM],
        out_specs=_VMEM,
    )(x, w_t, b)


def encoder_forward(enc_params, source):
    """source: (src_len, batch) int32. Returns final (h, c): (L, B, H) f32."""
    src_len, batch = source.shape
    l0, l1 = enc_params["layers"]
    hidden = l0["w_hh_t"].shape[0]

    # Embedding gather (glue) + hoisted time-batched layer-0 input projection:
    # one (T*B, E) x (E, 4H) matmul instead of T tiny B x E matmuls in the loop.
    embedded = enc_params["embedding"][source]                        # (T, B, E)
    x2d = _bf16(embedded.reshape(src_len * batch, -1))
    xproj0 = pallas_linear(x2d, _bf16(l0["w_ih_t"]), l0["b"])
    xproj0 = xproj0.reshape(src_len, batch, 4 * hidden)

    whh0 = _bf16(l0["w_hh_t"])
    wih1 = _bf16(l1["w_ih_t"])
    whh1 = _bf16(l1["w_hh_t"])
    b1 = l1["b"]

    state_shape = jax.ShapeDtypeStruct((NUM_LAYERS, batch, hidden), jnp.float32)
    state_spec = pl.BlockSpec((NUM_LAYERS, batch, hidden), lambda t: (0, 0, 0))

    h, c = pl.pallas_call(
        _encoder_kernel,
        grid=(src_len,),
        out_shape=(state_shape, state_shape),
        in_specs=[
            pl.BlockSpec((1, batch, 4 * hidden), lambda t: (t, 0, 0)),
            _resident_spec(whh0),
            _resident_spec(wih1),
            _resident_spec(whh1),
            _resident_spec(b1),
        ],
        out_specs=(state_spec, state_spec),
        compiler_params=pltpu.CompilerParams(
            dimension_semantics=("arbitrary",)),
    )(xproj0, whh0, wih1, whh1, b1)
    return h, c


def decoder_forward(dec_params, target, h0, c0, tf_flags):
    """Fused decode loop. Returns logits (max_len-1, batch, vocab) f32."""
    max_len, batch = target.shape
    l0, l1 = dec_params["layers"]
    hidden = l0["w_hh_t"].shape[0]
    emb = dec_params["embedding"]                 # (V, E) f32
    vocab, _ = emb.shape
    vpad = max(LANE, _round_up(vocab, LANE))

    # Lane-dense padded tables (resident in VMEM for the whole decode loop).
    emb_pad = _bf16(jnp.pad(emb, ((0, vpad - vocab), (0, 0))))
    out_w_pad = _bf16(jnp.pad(dec_params["out_w_t"],
                              ((0, 0), (0, vpad - vocab))))
    out_b_pad = jnp.pad(dec_params["out_b"], ((0, 0), (0, vpad - vocab)),
                        constant_values=-1e9)     # padded cols never win argmax

    # Target tokens as one-hot rows (tiny) -> in-kernel teacher forcing + init.
    tgt_oh = _bf16(target[..., None] == jnp.arange(vpad, dtype=target.dtype))

    wih0 = _bf16(l0["w_ih_t"])
    whh0 = _bf16(l0["w_hh_t"])
    wih1 = _bf16(l1["w_ih_t"])
    whh1 = _bf16(l1["w_hh_t"])

    steps = max_len - 1
    logits = pl.pallas_call(
        _decoder_kernel,
        grid=(steps,),
        out_shape=jax.ShapeDtypeStruct((steps, batch, vpad), jnp.float32),
        in_specs=[
            pl.BlockSpec(memory_space=pltpu.MemorySpace.SMEM),   # tf_flags
            _resident_spec(emb_pad),
            _resident_spec(wih0), _resident_spec(whh0), _resident_spec(l0["b"]),
            _resident_spec(wih1), _resident_spec(whh1), _resident_spec(l1["b"]),
            _resident_spec(out_w_pad), _resident_spec(out_b_pad),
            _resident_spec(tgt_oh),
            _resident_spec(h0), _resident_spec(c0),
        ],
        out_specs=pl.BlockSpec((1, batch, vpad), lambda i: (i, 0, 0)),
        scratch_shapes=[
            pltpu.VMEM((NUM_LAYERS, batch, hidden), jnp.float32),   # h carry
            pltpu.VMEM((NUM_LAYERS, batch, hidden), jnp.float32),   # c carry
            pltpu.VMEM((batch, vpad), jnp.bfloat16),                # token one-hot
        ],
        compiler_params=pltpu.CompilerParams(
            dimension_semantics=("arbitrary",)),
    )(tf_flags, emb_pad, wih0, whh0, l0["b"], wih1, whh1, l1["b"],
      out_w_pad, out_b_pad, tgt_oh, h0, c0)

    return logits[:, :, :vocab]


# --------------------------------------------------------------------------
# Model: parameter init + forward (mirrors the PyTorch module semantics)
# --------------------------------------------------------------------------

def init_params(key, vocab_size, embedding_size, hidden_size, num_layers):
    """Deterministic synthetic parameter init (PyTorch-like uniform)."""
    assert num_layers == NUM_LAYERS
    params = {}
    scale = 1.0 / jnp.sqrt(hidden_size)

    def unif(k, shape):
        return jax.random.uniform(k, shape, jnp.float32, -scale, scale)

    keys = jax.random.split(key, 64)
    ki = iter(range(64))

    for name in ("encoder", "decoder"):
        p = {"embedding": jax.random.normal(keys[next(ki)],
                                            (vocab_size, embedding_size),
                                            jnp.float32) * 0.1}
        layers = []
        for layer in range(num_layers):
            d_in = embedding_size if layer == 0 else hidden_size
            layers.append({
                # stored pre-transposed: (d_in, 4H) and (H, 4H)
                "w_ih_t": unif(keys[next(ki)], (d_in, 4 * hidden_size)),
                "w_hh_t": unif(keys[next(ki)], (hidden_size, 4 * hidden_size)),
                # b = b_ih + b_hh, kept 2-D (1, 4H) for clean broadcasting
                "b": unif(keys[next(ki)], (1, 4 * hidden_size))
                     + unif(keys[next(ki)], (1, 4 * hidden_size)),
            })
        p["layers"] = layers
        params[name] = p

    params["decoder"]["out_w_t"] = unif(keys[next(ki)], (hidden_size, vocab_size))
    params["decoder"]["out_b"] = unif(keys[next(ki)], (1, vocab_size))
    return params


def seq2seq_forward(params, source, target, tf_key, teacher_forcing_ratio=0.5):
    """Mirrors Seq2Seq.forward. source: (S, B), target: (T, B) int32."""
    max_len, batch = target.shape
    vocab = params["decoder"]["out_w_t"].shape[1]

    h, c = encoder_forward(params["encoder"], source)

    # One Bernoulli draw per generated token shared by the whole batch,
    # mirroring `random.random() < teacher_forcing_ratio` in the reference.
    draws = jax.random.uniform(tf_key, (max_len - 1,))
    tf_flags = (draws < teacher_forcing_ratio).astype(jnp.int32)

    dec_logits = decoder_forward(params["decoder"], target, h, c, tf_flags)

    # outputs[0] stays zero, exactly like the PyTorch reference.
    return jnp.concatenate(
        [jnp.zeros((1, batch, vocab), jnp.float32), dec_logits], axis=0)


# --------------------------------------------------------------------------
# Demo
# --------------------------------------------------------------------------

if __name__ == "__main__":
    # Small, TPU-friendly shapes consistent with the module's forward.
    VOCAB = 64          # input_size == output_size == len(vocab) (scaled down)
    EMBED = 128         # embedding_size
    HIDDEN = 128        # hidden_layer_size (scaled down, lane-aligned)
    BATCH = 8
    SRC_LEN = 8
    TGT_LEN = 8

    key = jax.random.PRNGKey(0)
    k_params, k_src, k_tgt, k_tf = jax.random.split(key, 4)

    params = init_params(k_params, VOCAB, EMBED, HIDDEN, NUM_LAYERS)

    source = jax.random.randint(k_src, (SRC_LEN, BATCH), 0, VOCAB, jnp.int32)
    target = jax.random.randint(k_tgt, (TGT_LEN, BATCH), 0, VOCAB, jnp.int32)

    forward = jax.jit(seq2seq_forward)
    outputs = forward(params, source, target, k_tf)
    outputs = jax.block_until_ready(outputs)

    assert outputs.shape == (TGT_LEN, BATCH, VOCAB)
    assert bool(jnp.all(jnp.isfinite(outputs)))
    assert bool(jnp.all(outputs[0] == 0.0))
    print("KERNEL_OK")
</pallas_src>

<mosaic_0001>
module attributes {stable_mosaic.version = 11 : i64} {
  func.func @_encoder_kernel(%arg0: i32, %arg1: memref<1x8x512xf32, #tpu.memory_space<vmem>>, %arg2: memref<128x512xbf16, #tpu.memory_space<vmem>>, %arg3: memref<128x512xbf16, #tpu.memory_space<vmem>>, %arg4: memref<128x512xbf16, #tpu.memory_space<vmem>>, %arg5: memref<1x512xf32, #tpu.memory_space<vmem>>, %arg6: memref<2x8x128xf32, #tpu.memory_space<vmem>>, %arg7: memref<2x8x128xf32, #tpu.memory_space<vmem>>) attributes {dimension_semantics = [#tpu.dimension_semantics<arbitrary>], iteration_bounds = array<i64: 8>, scalar_prefetch = 0 : i64, scratch_operands = 0 : i64, tpu.core_type = #tpu.core_type<tc>, window_params = [{transform_indices = @transform_0, window_bounds = array<i64: 1, 8, 512>}, {pipeline_mode = #tpu.pipeline_mode<synchronous>, transform_indices = @transform_1, window_bounds = array<i64: 128, 512>}, {pipeline_mode = #tpu.pipeline_mode<synchronous>, transform_indices = @transform_2, window_bounds = array<i64: 128, 512>}, {pipeline_mode = #tpu.pipeline_mode<synchronous>, transform_indices = @transform_3, window_bounds = array<i64: 128, 512>}, {pipeline_mode = #tpu.pipeline_mode<synchronous>, transform_indices = @transform_4, window_bounds = array<i64: 1, 512>}, {pipeline_mode = #tpu.pipeline_mode<synchronous>, transform_indices = @transform_5, window_bounds = array<i64: 2, 8, 128>}, {pipeline_mode = #tpu.pipeline_mode<synchronous>, transform_indices = @transform_6, window_bounds = array<i64: 2, 8, 128>}]} {
    %c0_i32 = arith.constant 0 : i32
    %0 = arith.cmpi eq, %arg0, %c0_i32 : i32
    %1 = arith.extui %0 : i1 to i32
    %c0_i32_0 = arith.constant 0 : i32
    %2 = arith.cmpi ne, %1, %c0_i32_0 : i32
    scf.if %2 {
      %cst_42 = arith.constant 0.000000e+00 : f32
      %89 = vector.broadcast %cst_42 : f32 to vector<2x8x128xf32>
      %c0_43 = arith.constant 0 : index
      %c0_44 = arith.constant 0 : index
      %c0_45 = arith.constant 0 : index
      %90 = vector.load %arg6[%c0_43, %c0_44, %c0_45] : memref<2x8x128xf32, #tpu.memory_space<vmem>>, vector<2x8x128xf32>
      tpu.vector_store %arg6[%c0_43, %c0_44, %c0_45], %89 {strides = array<i32>} : memref<2x8x128xf32, #tpu.memory_space<vmem>>, vector<2x8x128xf32>,
      %cst_46 = arith.constant 0.000000e+00 : f32
      %91 = vector.broadcast %cst_46 : f32 to vector<2x8x128xf32>
      %c0_47 = arith.constant 0 : index
      %c0_48 = arith.constant 0 : index
      %c0_49 = arith.constant 0 : index
      %92 = vector.load %arg7[%c0_47, %c0_48, %c0_49] : memref<2x8x128xf32, #tpu.memory_space<vmem>>, vector<2x8x128xf32>
      tpu.vector_store %arg7[%c0_47, %c0_48, %c0_49], %91 {strides = array<i32>} : memref<2x8x128xf32, #tpu.memory_space<vmem>>, vector<2x8x128xf32>,
    } else {
    }
    %c0 = arith.constant 0 : index
    %c0_1 = arith.constant 0 : index
    %c0_2 = arith.constant 0 : index
    %3 = vector.load %arg1[%c0, %c0_1, %c0_2] : memref<1x8x512xf32, #tpu.memory_space<vmem>>, vector<1x8x512xf32>
    %4 = vector.shape_cast %3 : vector<1x8x512xf32> to vector<8x512xf32>
    %c0_3 = arith.constant 0 : index
    %c0_4 = arith.constant 0 : index
    %c0_5 = arith.constant 0 : index
    %5 = vector.load %arg6[%c0_3, %c0_4, %c0_5] : memref<2x8x128xf32, #tpu.memory_space<vmem>>, vector<1x8x128xf32>
    %6 = vector.shape_cast %5 : vector<1x8x128xf32> to vector<8x128xf32>
    %7 = arith.truncf %6 : vector<8x128xf32> to vector<8x128xbf16>
    %c0_6 = arith.constant 0 : index
    %c0_7 = arith.constant 0 : index
    %8 = vector.load %arg2[%c0_6, %c0_7] : memref<128x512xbf16, #tpu.memory_space<vmem>>, vector<128x512xbf16>
    %cst = arith.constant dense<0.000000e+00> : vector<8x512xf32>
    %9 = tpu.matmul %7, %8, %cst {dimension_numbers = #tpu.dot_dimension_numbers<[1], [0], [0], [1], [0, 0, 1, 1], [], []>} : vector<8x128xbf16>, vector<128x512xbf16>, vector<8x512xf32> -> vector<8x512xf32>
    %10 = arith.addf %4, %9 : vector<8x512xf32>
    %c0_8 = arith.constant 0 : index
    %c0_9 = arith.constant 0 : index
    %c0_10 = arith.constant 0 : index
    %11 = vector.load %arg7[%c0_8, %c0_9, %c0_10] : memref<2x8x128xf32, #tpu.memory_space<vmem>>, vector<1x8x128xf32>
    %12 = vector.shape_cast %11 : vector<1x8x128xf32> to vector<8x128xf32>
    %13 = vector.extract_strided_slice %10 {offsets = [0, 0], sizes = [8, 128], strides = [1, 1]} : vector<8x512xf32> to vector<8x128xf32>
    %14 = arith.negf %13 : vector<8x128xf32>
    %15 = math.exp %14 : vector<8x128xf32>
    %cst_11 = arith.constant 1.000000e+00 : f32
    %16 = vector.broadcast %cst_11 : f32 to vector<8x128xf32>
    %17 = arith.addf %16, %15 : vector<8x128xf32>
    %18 = arith.divf %16, %17 : vector<8x128xf32>
    %19 = vector.extract_strided_slice %10 {offsets = [0, 128], sizes = [8, 128], strides = [1, 1]} : vector<8x512xf32> to vector<8x128xf32>
    %20 = arith.negf %19 : vector<8x128xf32>
    %21 = math.exp %20 : vector<8x128xf32>
    %cst_12 = arith.constant 1.000000e+00 : f32
    %22 = vector.broadcast %cst_12 : f32 to vector<8x128xf32>
    %23 = arith.addf %22, %21 : vector<8x128xf32>
    %24 = arith.divf %22, %23 : vector<8x128xf32>
    %25 = vector.extract_strided_slice %10 {offsets = [0, 256], sizes = [8, 128], strides = [1, 1]} : vector<8x512xf32> to vector<8x128xf32>
    %26 = math.tanh %25 : vector<8x128xf32>
    %27 = vector.extract_strided_slice %10 {offsets = [0, 384], sizes = [8, 128], strides = [1, 1]} : vector<8x512xf32> to vector<8x128xf32>
    %28 = arith.negf %27 : vector<8x128xf32>
    %29 = math.exp %28 : vector<8x128xf32>
    %cst_13 = arith.constant 1.000000e+00 : f32
    %30 = vector.broadcast %cst_13 : f32 to vector<8x128xf32>
    %31 = arith.addf %30, %29 : vector<8x128xf32>
    %32 = arith.divf %30, %31 : vector<8x128xf32>
    %33 = arith.mulf %24, %12 : vector<8x128xf32>
    %34 = arith.mulf %18, %26 : vector<8x128xf32>
    %35 = arith.addf %33, %34 : vector<8x128xf32>
    %36 = math.tanh %35 : vector<8x128xf32>
    %37 = arith.mulf %32, %36 : vector<8x128xf32>
    %38 = arith.truncf %37 : vector<8x128xf32> to vector<8x128xbf16>
    %c0_14 = arith.constant 0 : index
    %c0_15 = arith.constant 0 : index
    %39 = vector.load %arg3[%c0_14, %c0_15] : memref<128x512xbf16, #tpu.memory_space<vmem>>, vector<128x512xbf16>
    %cst_16 = arith.constant dense<0.000000e+00> : vector<8x512xf32>
    %40 = tpu.matmul %38, %39, %cst_16 {dimension_numbers = #tpu.dot_dimension_numbers<[1], [0], [0], [1], [0, 0, 1, 1], [], []>} : vector<8x128xbf16>, vector<128x512xbf16>, vector<8x512xf32> -> vector<8x512xf32>
    %c1 = arith.constant 1 : index
    %c0_17 = arith.constant 0 : index
    %c0_18 = arith.constant 0 : index
    %41 = vector.load %arg6[%c1, %c0_17, %c0_18] : memref<2x8x128xf32, #tpu.memory_space<vmem>>, vector<1x8x128xf32>
    %42 = vector.shape_cast %41 : vector<1x8x128xf32> to vector<8x128xf32>
    %43 = arith.truncf %42 : vector<8x128xf32> to vector<8x128xbf16>
    %c0_19 = arith.constant 0 : index
    %c0_20 = arith.constant 0 : index
    %44 = vector.load %arg4[%c0_19, %c0_20] : memref<128x512xbf16, #tpu.memory_space<vmem>>, vector<128x512xbf16>
    %cst_21 = arith.constant dense<0.000000e+00> : vector<8x512xf32>
    %45 = tpu.matmul %43, %44, %cst_21 {dimension_numbers = #tpu.dot_dimension_numbers<[1], [0], [0], [1], [0, 0, 1, 1], [], []>} : vector<8x128xbf16>, vector<128x512xbf16>, vector<8x512xf32> -> vector<8x512xf32>
    %46 = arith.addf %40, %45 : vector<8x512xf32>
    %c0_22 = arith.constant 0 : index
    %c0_23 = arith.constant 0 : index
    %47 = vector.load %arg5[%c0_22, %c0_23] : memref<1x512xf32, #tpu.memory_space<vmem>>, vector<1x512xf32>
    %48 = vector.broadcast %47 : vector<1x512xf32> to vector<8x512xf32>
    %49 = arith.addf %46, %48 : vector<8x512xf32>
    %c1_24 = arith.constant 1 : index
    %c0_25 = arith.constant 0 : index
    %c0_26 = arith.constant 0 : index
    %50 = vector.load %arg7[%c1_24, %c0_25, %c0_26] : memref<2x8x128xf32, #tpu.memory_space<vmem>>, vector<1x8x128xf32>
    %51 = vector.shape_cast %50 : vector<1x8x128xf32> to vector<8x128xf32>
    %52 = vector.extract_strided_slice %49 {offsets = [0, 0], sizes = [8, 128], strides = [1, 1]} : vector<8x512xf32> to vector<8x128xf32>
    %53 = arith.negf %52 : vector<8x128xf32>
    %54 = math.exp %53 : vector<8x128xf32>
    %cst_27 = arith.constant 1.000000e+00 : f32
    %55 = vector.broadcast %cst_27 : f32 to vector<8x128xf32>
    %56 = arith.addf %55, %54 : vector<8x128xf32>
    %57 = arith.divf %55, %56 : vector<8x128xf32>
    %58 = vector.extract_strided_slice %49 {offsets = [0, 128], sizes = [8, 128], strides = [1, 1]} : vector<8x512xf32> to vector<8x128xf32>
    %59 = arith.negf %58 : vector<8x128xf32>
    %60 = math.exp %59 : vector<8x128xf32>
    %cst_28 = arith.constant 1.000000e+00 : f32
    %61 = vector.broadcast %cst_28 : f32 to vector<8x128xf32>
    %62 = arith.addf %61, %60 : vector<8x128xf32>
    %63 = arith.divf %61, %62 : vector<8x128xf32>
    %64 = vector.extract_strided_slice %49 {offsets = [0, 256], sizes = [8, 128], strides = [1, 1]} : vector<8x512xf32> to vector<8x128xf32>
    %65 = math.tanh %64 : vector<8x128xf32>
    %66 = vector.extract_strided_slice %49 {offsets = [0, 384], sizes = [8, 128], strides = [1, 1]} : vector<8x512xf32> to vector<8x128xf32>
    %67 = arith.negf %66 : vector<8x128xf32>
    %68 = math.exp %67 : vector<8x128xf32>
    %cst_29 = arith.constant 1.000000e+00 : f32
    %69 = vector.broadcast %cst_29 : f32 to vector<8x128xf32>
    %70 = arith.addf %69, %68 : vector<8x128xf32>
    %71 = arith.divf %69, %70 : vector<8x128xf32>
    %72 = arith.mulf %63, %51 : vector<8x128xf32>
    %73 = arith.mulf %57, %65 : vector<8x128xf32>
    %74 = arith.addf %72, %73 : vector<8x128xf32>
    %75 = math.tanh %74 : vector<8x128xf32>
    %76 = arith.mulf %71, %75 : vector<8x128xf32>
    %c0_30 = arith.constant 0 : index
    %c0_31 = arith.constant 0 : index
    %c0_32 = arith.constant 0 : index
    %77 = vector.load %arg6[%c0_30, %c0_31, %c0_32] : memref<2x8x128xf32, #tpu.memory_space<vmem>>, vector<1x8x128xf32>
    %78 = vector.shape_cast %77 : vector<1x8x128xf32> to vector<8x128xf32>
    %79 = vector.shape_cast %37 : vector<8x128xf32> to vector<1x8x128xf32>
    tpu.vector_store %arg6[%c0_30, %c0_31, %c0_32], %79 {strides = array<i32>} : memref<2x8x128xf32, #tpu.memory_space<vmem>>, vector<1x8x128xf32>,
    %c1_33 = arith.constant 1 : index
    %c0_34 = arith.constant 0 : index
    %c0_35 = arith.constant 0 : index
    %80 = vector.load %arg6[%c1_33, %c0_34, %c0_35] : memref<2x8x128xf32, #tpu.memory_space<vmem>>, vector<1x8x128xf32>
    %81 = vector.shape_cast %80 : vector<1x8x128xf32> to vector<8x128xf32>
    %82 = vector.shape_cast %76 : vector<8x128xf32> to vector<1x8x128xf32>
    tpu.vector_store %arg6[%c1_33, %c0_34, %c0_35], %82 {strides = array<i32>} : memref<2x8x128xf32, #tpu.memory_space<vmem>>, vector<1x8x128xf32>,
    %c0_36 = arith.constant 0 : index
    %c0_37 = arith.constant 0 : index
    %c0_38 = arith.constant 0 : index
    %83 = vector.load %arg7[%c0_36, %c0_37, %c0_38] : memref<2x8x128xf32, #tpu.memory_space<vmem>>, vector<1x8x128xf32>
    %84 = vector.shape_cast %83 : vector<1x8x128xf32> to vector<8x128xf32>
    %85 = vector.shape_cast %35 : vector<8x128xf32> to vector<1x8x128xf32>
    tpu.vector_store %arg7[%c0_36, %c0_37, %c0_38], %85 {strides = array<i32>} : memref<2x8x128xf32, #tpu.memory_space<vmem>>, vector<1x8x128xf32>,
    %c1_39 = arith.constant 1 : index
    %c0_40 = arith.constant 0 : index
    %c0_41 = arith.constant 0 : index
    %86 = vector.load %arg7[%c1_39, %c0_40, %c0_41] : memref<2x8x128xf32, #tpu.memory_space<vmem>>, vector<1x8x128xf32>
    %87 = vector.shape_cast %86 : vector<1x8x128xf32> to vector<8x128xf32>
    %88 = vector.shape_cast %74 : vector<8x128xf32> to vector<1x8x128xf32>
    tpu.vector_store %arg7[%c1_39, %c0_40, %c0_41], %88 {strides = array<i32>} : memref<2x8x128xf32, #tpu.memory_space<vmem>>, vector<1x8x128xf32>,
    return
  }
  func.func @transform_0(%arg0: i32) -> (i32, i32, i32) {
    %c0_i32 = arith.constant 0 : i32
    %c0_i32_0 = arith.constant 0 : i32
    %c0_i32_1 = arith.constant 0 : i32
    return %arg0, %c0_i32, %c0_i32_0 : i32, i32, i32
  }
  func.func @transform_1(%arg0: i32) -> (i32, i32) {
    %c0_i32 = arith.constant 0 : i32
    %c0_i32_0 = arith.constant 0 : i32
    %c0_i32_1 = arith.constant 0 : i32
    return %c0_i32, %c0_i32_0 : i32, i32
  }
  func.func @transform_2(%arg0: i32) -> (i32, i32) {
    %c0_i32 = arith.constant 0 : i32
    %c0_i32_0 = arith.constant 0 : i32
    %c0_i32_1 = arith.constant 0 : i32
    return %c0_i32, %c0_i32_0 : i32, i32
  }
  func.func @transform_3(%arg0: i32) -> (i32, i32) {
    %c0_i32 = arith.constant 0 : i32
    %c0_i32_0 = arith.constant 0 : i32
    %c0_i32_1 = arith.constant 0 : i32
    return %c0_i32, %c0_i32_0 : i32, i32
  }
  func.func @transform_4(%arg0: i32) -> (i32, i32) {
    %c0_i32 = arith.constant 0 : i32
    %c0_i32_0 = arith.constant 0 : i32
    %c0_i32_1 = arith.constant 0 : i32
    return %c0_i32, %c0_i32_0 : i32, i32
  }
  func.func @transform_5(%arg0: i32) -> (i32, i32, i32) {
    %c0_i32 = arith.constant 0 : i32
    %c0_i32_0 = arith.constant 0 : i32
    %c0_i32_1 = arith.constant 0 : i32
    %c0_i32_2 = arith.constant 0 : i32
    return %c0_i32, %c0_i32_0, %c0_i32_1 : i32, i32, i32
  }
  func.func @transform_6(%arg0: i32) -> (i32, i32, i32) {
    %c0_i32 = arith.constant 0 : i32
    %c0_i32_0 = arith.constant 0 : i32
    %c0_i32_1 = arith.constant 0 : i32
    %c0_i32_2 = arith.constant 0 : i32
    return %c0_i32, %c0_i32_0, %c0_i32_1 : i32, i32, i32
  }
}

module attributes {stable_mosaic.version = 11 : i64} {
  func.func @_linear_kernel(%arg0: memref<64x128xbf16, #tpu.memory_space<vmem>>, %arg1: memref<128x512xbf16, #tpu.memory_space<vmem>>, %arg2: memref<1x512xf32, #tpu.memory_space<vmem>>, %arg3: memref<64x512xf32, #tpu.memory_space<vmem>>) attributes {dimension_semantics = [], scalar_prefetch = 0 : i64, scratch_operands = 0 : i64, tpu.core_type = #tpu.core_type<tc>} {
    %c0 = arith.constant 0 : index
    %c0_0 = arith.constant 0 : index
    %0 = vector.load %arg0[%c0, %c0_0] : memref<64x128xbf16, #tpu.memory_space<vmem>>, vector<64x128xbf16>
    %c0_1 = arith.constant 0 : index
    %c0_2 = arith.constant 0 : index
    %1 = vector.load %arg1[%c0_1, %c0_2] : memref<128x512xbf16, #tpu.memory_space<vmem>>, vector<128x512xbf16>
    %cst = arith.constant dense<0.000000e+00> : vector<64x512xf32>
    %2 = tpu.matmul %0, %1, %cst {dimension_numbers = #tpu.dot_dimension_numbers<[1], [0], [0], [1], [0, 0, 1, 1], [], []>} : vector<64x128xbf16>, vector<128x512xbf16>, vector<64x512xf32> -> vector<64x512xf32>
    %c0_3 = arith.constant 0 : index
    %c0_4 = arith.constant 0 : index
    %3 = vector.load %arg2[%c0_3, %c0_4] : memref<1x512xf32, #tpu.memory_space<vmem>>, vector<1x512xf32>
    %4 = vector.broadcast %3 : vector<1x512xf32> to vector<64x512xf32>
    %5 = arith.addf %2, %4 : vector<64x512xf32>
    %c0_5 = arith.constant 0 : index
    %c0_6 = arith.constant 0 : index
    %6 = vector.load %arg3[%c0_5, %c0_6] : memref<64x512xf32, #tpu.memory_space<vmem>>, vector<64x512xf32>
    tpu.vector_store %arg3[%c0_5, %c0_6], %5 {strides = array<i32>} : memref<64x512xf32, #tpu.memory_space<vmem>>, vector<64x512xf32>,
    return
  }
}

module attributes {stable_mosaic.version = 11 : i64} {
  func.func @_decoder_kernel(%arg0: i32, %arg1: memref<7xi32, #tpu.memory_space<smem>>, %arg2: memref<128x128xbf16, #tpu.memory_space<vmem>>, %arg3: memref<128x512xbf16, #tpu.memory_space<vmem>>, %arg4: memref<128x512xbf16, #tpu.memory_space<vmem>>, %arg5: memref<1x512xf32, #tpu.memory_space<vmem>>, %arg6: memref<128x512xbf16, #tpu.memory_space<vmem>>, %arg7: memref<128x512xbf16, #tpu.memory_space<vmem>>, %arg8: memref<1x512xf32, #tpu.memory_space<vmem>>, %arg9: memref<128x128xbf16, #tpu.memory_space<vmem>>, %arg10: memref<1x128xf32, #tpu.memory_space<vmem>>, %arg11: memref<8x8x128xbf16, #tpu.memory_space<vmem>>, %arg12: memref<2x8x128xf32, #tpu.memory_space<vmem>>, %arg13: memref<2x8x128xf32, #tpu.memory_space<vmem>>, %arg14: memref<1x8x128xf32, #tpu.memory_space<vmem>>, %arg15: memref<2x8x128xf32, #tpu.memory_space<vmem>>, %arg16: memref<2x8x128xf32, #tpu.memory_space<vmem>>, %arg17: memref<8x128xbf16, #tpu.memory_space<vmem>>) attributes {dimension_semantics = [#tpu.dimension_semantics<arbitrary>], iteration_bounds = array<i64: 7>, scalar_prefetch = 0 : i64, scratch_operands = 3 : i64, tpu.core_type = #tpu.core_type<tc>, window_params = [{transform_indices = @transform_0, window_bounds = array<i64: 7>}, {pipeline_mode = #tpu.pipeline_mode<synchronous>, transform_indices = @transform_1, window_bounds = array<i64: 128, 128>}, {pipeline_mode = #tpu.pipeline_mode<synchronous>, transform_indices = @transform_2, window_bounds = array<i64: 128, 512>}, {pipeline_mode = #tpu.pipeline_mode<synchronous>, transform_indices = @transform_3, window_bounds = array<i64: 128, 512>}, {pipeline_mode = #tpu.pipeline_mode<synchronous>, transform_indices = @transform_4, window_bounds = array<i64: 1, 512>}, {pipeline_mode = #tpu.pipeline_mode<synchronous>, transform_indices = @transform_5, window_bounds = array<i64: 128, 512>}, {pipeline_mode = #tpu.pipeline_mode<synchronous>, transform_indices = @transform_6, window_bounds = array<i64: 128, 512>}, {pipeline_mode = #tpu.pipeline_mode<synchronous>, transform_indices = @transform_7, window_bounds = array<i64: 1, 512>}, {pipeline_mode = #tpu.pipeline_mode<synchronous>, transform_indices = @transform_8, window_bounds = array<i64: 128, 128>}, {pipeline_mode = #tpu.pipeline_mode<synchronous>, transform_indices = @transform_9, window_bounds = array<i64: 1, 128>}, {pipeline_mode = #tpu.pipeline_mode<synchronous>, transform_indices = @transform_10, window_bounds = array<i64: 8, 8, 128>}, {pipeline_mode = #tpu.pipeline_mode<synchronous>, transform_indices = @transform_11, window_bounds = array<i64: 2, 8, 128>}, {pipeline_mode = #tpu.pipeline_mode<synchronous>, transform_indices = @transform_12, window_bounds = array<i64: 2, 8, 128>}, {transform_indices = @transform_13, window_bounds = array<i64: 1, 8, 128>}]} {
    %c0_i32 = arith.constant 0 : i32
    %0 = arith.cmpi eq, %arg0, %c0_i32 : i32
    %1 = arith.extui %0 : i1 to i32
    %c0_i32_0 = arith.constant 0 : i32
    %2 = arith.cmpi ne, %1, %c0_i32_0 : i32
    scf.if %2 {
      %c0_64 = arith.constant 0 : index
      %c0_65 = arith.constant 0 : index
      %c0_66 = arith.constant 0 : index
      %128 = vector.load %arg12[%c0_64, %c0_65, %c0_66] : memref<2x8x128xf32, #tpu.memory_space<vmem>>, vector<2x8x128xf32>
      %c0_67 = arith.constant 0 : index
      %c0_68 = arith.constant 0 : index
      %c0_69 = arith.constant 0 : index
      %129 = vector.load %arg15[%c0_67, %c0_68, %c0_69] : memref<2x8x128xf32, #tpu.memory_space<vmem>>, vector<2x8x128xf32>
      tpu.vector_store %arg15[%c0_67, %c0_68, %c0_69], %128 {strides = array<i32>} : memref<2x8x128xf32, #tpu.memory_space<vmem>>, vector<2x8x128xf32>,
      %c0_70 = arith.constant 0 : index
      %c0_71 = arith.constant 0 : index
      %c0_72 = arith.constant 0 : index
      %130 = vector.load %arg13[%c0_70, %c0_71, %c0_72] : memref<2x8x128xf32, #tpu.memory_space<vmem>>, vector<2x8x128xf32>
      %c0_73 = arith.constant 0 : index
      %c0_74 = arith.constant 0 : index
      %c0_75 = arith.constant 0 : index
      %131 = vector.load %arg16[%c0_73, %c0_74, %c0_75] : memref<2x8x128xf32, #tpu.memory_space<vmem>>, vector<2x8x128xf32>
      tpu.vector_store %arg16[%c0_73, %c0_74, %c0_75], %130 {strides = array<i32>} : memref<2x8x128xf32, #tpu.memory_space<vmem>>, vector<2x8x128xf32>,
      %c0_76 = arith.constant 0 : index
      %c0_77 = arith.constant 0 : index
      %c0_78 = arith.constant 0 : index
      %132 = vector.load %arg11[%c0_76, %c0_77, %c0_78] : memref<8x8x128xbf16, #tpu.memory_space<vmem>>, vector<1x8x128xbf16>
      %133 = vector.shape_cast %132 : vector<1x8x128xbf16> to vector<8x128xbf16>
      %c0_79 = arith.constant 0 : index
      %c0_80 = arith.constant 0 : index
      %134 = vector.load %arg17[%c0_79, %c0_80] : memref<8x128xbf16, #tpu.memory_space<vmem>>, vector<8x128xbf16>
      tpu.vector_store %arg17[%c0_79, %c0_80], %133 {strides = array<i32>} : memref<8x128xbf16, #tpu.memory_space<vmem>>, vector<8x128xbf16>,
    } else {
    }
    %c0 = arith.constant 0 : index
    %c0_1 = arith.constant 0 : index
    %3 = vector.load %arg17[%c0, %c0_1] : memref<8x128xbf16, #tpu.memory_space<vmem>>, vector<8x128xbf16>
    %c0_2 = arith.constant 0 : index
    %c0_3 = arith.constant 0 : index
    %4 = vector.load %arg2[%c0_2, %c0_3] : memref<128x128xbf16, #tpu.memory_space<vmem>>, vector<128x128xbf16>
    %cst = arith.constant dense<0.000000e+00> : vector<8x128xf32>
    %5 = tpu.matmul %3, %4, %cst {dimension_numbers = #tpu.dot_dimension_numbers<[1], [0], [0], [1], [0, 0, 1, 1], [], []>} : vector<8x128xbf16>, vector<128x128xbf16>, vector<8x128xf32> -> vector<8x128xf32>
    %6 = arith.truncf %5 : vector<8x128xf32> to vector<8x128xbf16>
    %c0_4 = arith.constant 0 : index
    %c0_5 = arith.constant 0 : index
    %7 = vector.load %arg3[%c0_4, %c0_5] : memref<128x512xbf16, #tpu.memory_space<vmem>>, vector<128x512xbf16>
    %cst_6 = arith.constant dense<0.000000e+00> : vector<8x512xf32>
    %8 = tpu.matmul %6, %7, %cst_6 {dimension_numbers = #tpu.dot_dimension_numbers<[1], [0], [0], [1], [0, 0, 1, 1], [], []>} : vector<8x128xbf16>, vector<128x512xbf16>, vector<8x512xf32> -> vector<8x512xf32>
    %c0_7 = arith.constant 0 : index
    %c0_8 = arith.constant 0 : index
    %c0_9 = arith.constant 0 : index
    %9 = vector.load %arg15[%c0_7, %c0_8, %c0_9] : memref<2x8x128xf32, #tpu.memory_space<vmem>>, vector<1x8x128xf32>
    %10 = vector.shape_cast %9 : vector<1x8x128xf32> to vector<8x128xf32>
    %11 = arith.truncf %10 : vector<8x128xf32> to vector<8x128xbf16>
    %c0_10 = arith.constant 0 : index
    %c0_11 = arith.constant 0 : index
    %12 = vector.load %arg4[%c0_10, %c0_11] : memref<128x512xbf16, #tpu.memory_space<vmem>>, vector<128x512xbf16>
    %cst_12 = arith.constant dense<0.000000e+00> : vector<8x512xf32>
    %13 = tpu.matmul %11, %12, %cst_12 {dimension_numbers = #tpu.dot_dimension_numbers<[1], [0], [0], [1], [0, 0, 1, 1], [], []>} : vector<8x128xbf16>, vector<128x512xbf16>, vector<8x512xf32> -> vector<8x512xf32>
    %14 = arith.addf %8, %13 : vector<8x512xf32>
    %c0_13 = arith.constant 0 : index
    %c0_14 = arith.constant 0 : index
    %15 = vector.load %arg5[%c0_13, %c0_14] : memref<1x512xf32, #tpu.memory_space<vmem>>, vector<1x512xf32>
    %16 = vector.broadcast %15 : vector<1x512xf32> to vector<8x512xf32>
    %17 = arith.addf %14, %16 : vector<8x512xf32>
    %c0_15 = arith.constant 0 : index
    %c0_16 = arith.constant 0 : index
    %c0_17 = arith.constant 0 : index
    %18 = vector.load %arg16[%c0_15, %c0_16, %c0_17] : memref<2x8x128xf32, #tpu.memory_space<vmem>>, vector<1x8x128xf32>
    %19 = vector.shape_cast %18 : vector<1x8x128xf32> to vector<8x128xf32>
    %20 = vector.extract_strided_slice %17 {offsets = [0, 0], sizes = [8, 128], strides = [1, 1]} : vector<8x512xf32> to vector<8x128xf32>
    %21 = arith.negf %20 : vector<8x128xf32>
    %22 = math.exp %21 : vector<8x128xf32>
    %cst_18 = arith.constant 1.000000e+00 : f32
    %23 = vector.broadcast %cst_18 : f32 to vector<8x128xf32>
    %24 = arith.addf %23, %22 : vector<8x128xf32>
    %25 = arith.divf %23, %24 : vector<8x128xf32>
    %26 = vector.extract_strided_slice %17 {offsets = [0, 128], sizes = [8, 128], strides = [1, 1]} : vector<8x512xf32> to vector<8x128xf32>
    %27 = arith.negf %26 : vector<8x128xf32>
    %28 = math.exp %27 : vector<8x128xf32>
    %cst_19 = arith.constant 1.000000e+00 : f32
    %29 = vector.broadcast %cst_19 : f32 to vector<8x128xf32>
    %30 = arith.addf %29, %28 : vector<8x128xf32>
    %31 = arith.divf %29, %30 : vector<8x128xf32>
    %32 = vector.extract_strided_slice %17 {offsets = [0, 256], sizes = [8, 128], strides = [1, 1]} : vector<8x512xf32> to vector<8x128xf32>
    %33 = math.tanh %32 : vector<8x128xf32>
    %34 = vector.extract_strided_slice %17 {offsets = [0, 384], sizes = [8, 128], strides = [1, 1]} : vector<8x512xf32> to vector<8x128xf32>
    %35 = arith.negf %34 : vector<8x128xf32>
    %36 = math.exp %35 : vector<8x128xf32>
    %cst_20 = arith.constant 1.000000e+00 : f32
    %37 = vector.broadcast %cst_20 : f32 to vector<8x128xf32>
    %38 = arith.addf %37, %36 : vector<8x128xf32>
    %39 = arith.divf %37, %38 : vector<8x128xf32>
    %40 = arith.mulf %31, %19 : vector<8x128xf32>
    %41 = arith.mulf %25, %33 : vector<8x128xf32>
    %42 = arith.addf %40, %41 : vector<8x128xf32>
    %43 = math.tanh %42 : vector<8x128xf32>
    %44 = arith.mulf %39, %43 : vector<8x128xf32>
    %45 = arith.truncf %44 : vector<8x128xf32> to vector<8x128xbf16>
    %c0_21 = arith.constant 0 : index
    %c0_22 = arith.constant 0 : index
    %46 = vector.load %arg6[%c0_21, %c0_22] : memref<128x512xbf16, #tpu.memory_space<vmem>>, vector<128x512xbf16>
    %cst_23 = arith.constant dense<0.000000e+00> : vector<8x512xf32>
    %47 = tpu.matmul %45, %46, %cst_23 {dimension_numbers = #tpu.dot_dimension_numbers<[1], [0], [0], [1], [0, 0, 1, 1], [], []>} : vector<8x128xbf16>, vector<128x512xbf16>, vector<8x512xf32> -> vector<8x512xf32>
    %c1 = arith.constant 1 : index
    %c0_24 = arith.constant 0 : index
    %c0_25 = arith.constant 0 : index
    %48 = vector.load %arg15[%c1, %c0_24, %c0_25] : memref<2x8x128xf32, #tpu.memory_space<vmem>>, vector<1x8x128xf32>
    %49 = vector.shape_cast %48 : vector<1x8x128xf32> to vector<8x128xf32>
    %50 = arith.truncf %49 : vector<8x128xf32> to vector<8x128xbf16>
    %c0_26 = arith.constant 0 : index
    %c0_27 = arith.constant 0 : index
    %51 = vector.load %arg7[%c0_26, %c0_27] : memref<128x512xbf16, #tpu.memory_space<vmem>>, vector<128x512xbf16>
    %cst_28 = arith.constant dense<0.000000e+00> : vector<8x512xf32>
    %52 = tpu.matmul %50, %51, %cst_28 {dimension_numbers = #tpu.dot_dimension_numbers<[1], [0], [0], [1], [0, 0, 1, 1], [], []>} : vector<8x128xbf16>, vector<128x512xbf16>, vector<8x512xf32> -> vector<8x512xf32>
    %53 = arith.addf %47, %52 : vector<8x512xf32>
    %c0_29 = arith.constant 0 : index
    %c0_30 = arith.constant 0 : index
    %54 = vector.load %arg8[%c0_29, %c0_30] : memref<1x512xf32, #tpu.memory_space<vmem>>, vector<1x512xf32>
    %55 = vector.broadcast %54 : vector<1x512xf32> to vector<8x512xf32>
    %56 = arith.addf %53, %55 : vector<8x512xf32>
    %c1_31 = arith.constant 1 : index
    %c0_32 = arith.constant 0 : index
    %c0_33 = arith.constant 0 : index
    %57 = vector.load %arg16[%c1_31, %c0_32, %c0_33] : memref<2x8x128xf32, #tpu.memory_space<vmem>>, vector<1x8x128xf32>
    %58 = vector.shape_cast %57 : vector<1x8x128xf32> to vector<8x128xf32>
    %59 = vector.extract_strided_slice %56 {offsets = [0, 0], sizes = [8, 128], strides = [1, 1]} : vector<8x512xf32> to vector<8x128xf32>
    %60 = arith.negf %59 : vector<8x128xf32>
    %61 = math.exp %60 : vector<8x128xf32>
    %cst_34 = arith.constant 1.000000e+00 : f32
    %62 = vector.broadcast %cst_34 : f32 to vector<8x128xf32>
    %63 = arith.addf %62, %61 : vector<8x128xf32>
    %64 = arith.divf %62, %63 : vector<8x128xf32>
    %65 = vector.extract_strided_slice %56 {offsets = [0, 128], sizes = [8, 128], strides = [1, 1]} : vector<8x512xf32> to vector<8x128xf32>
    %66 = arith.negf %65 : vector<8x128xf32>
    %67 = math.exp %66 : vector<8x128xf32>
    %cst_35 = arith.constant 1.000000e+00 : f32
    %68 = vector.broadcast %cst_35 : f32 to vector<8x128xf32>
    %69 = arith.addf %68, %67 : vector<8x128xf32>
    %70 = arith.divf %68, %69 : vector<8x128xf32>
    %71 = vector.extract_strided_slice %56 {offsets = [0, 256], sizes = [8, 128], strides = [1, 1]} : vector<8x512xf32> to vector<8x128xf32>
    %72 = math.tanh %71 : vector<8x128xf32>
    %73 = vector.extract_strided_slice %56 {offsets = [0, 384], sizes = [8, 128], strides = [1, 1]} : vector<8x512xf32> to vector<8x128xf32>
    %74 = arith.negf %73 : vector<8x128xf32>
    %75 = math.exp %74 : vector<8x128xf32>
    %cst_36 = arith.constant 1.000000e+00 : f32
    %76 = vector.broadcast %cst_36 : f32 to vector<8x128xf32>
    %77 = arith.addf %76, %75 : vector<8x128xf32>
    %78 = arith.divf %76, %77 : vector<8x128xf32>
    %79 = arith.mulf %70, %58 : vector<8x128xf32>
    %80 = arith.mulf %64, %72 : vector<8x128xf32>
    %81 = arith.addf %79, %80 : vector<8x128xf32>
    %82 = math.tanh %81 : vector<8x128xf32>
    %83 = arith.mulf %78, %82 : vector<8x128xf32>
    %c0_37 = arith.constant 0 : index
    %c0_38 = arith.constant 0 : index
    %c0_39 = arith.constant 0 : index
    %84 = vector.load %arg15[%c0_37, %c0_38, %c0_39] : memref<2x8x128xf32, #tpu.memory_space<vmem>>, vector<1x8x128xf32>
    %85 = vector.shape_cast %84 : vector<1x8x128xf32> to vector<8x128xf32>
    %86 = vector.shape_cast %44 : vector<8x128xf32> to vector<1x8x128xf32>
    tpu.vector_store %arg15[%c0_37, %c0_38, %c0_39], %86 {strides = array<i32>} : memref<2x8x128xf32, #tpu.memory_space<vmem>>, vector<1x8x128xf32>,
    %c1_40 = arith.constant 1 : index
    %c0_41 = arith.constant 0 : index
    %c0_42 = arith.constant 0 : index
    %87 = vector.load %arg15[%c1_40, %c0_41, %c0_42] : memref<2x8x128xf32, #tpu.memory_space<vmem>>, vector<1x8x128xf32>
    %88 = vector.shape_cast %87 : vector<1x8x128xf32> to vector<8x128xf32>
    %89 = vector.shape_cast %83 : vector<8x128xf32> to vector<1x8x128xf32>
    tpu.vector_store %arg15[%c1_40, %c0_41, %c0_42], %89 {strides = array<i32>} : memref<2x8x128xf32, #tpu.memory_space<vmem>>, vector<1x8x128xf32>,
    %c0_43 = arith.constant 0 : index
    %c0_44 = arith.constant 0 : index
    %c0_45 = arith.constant 0 : index
    %90 = vector.load %arg16[%c0_43, %c0_44, %c0_45] : memref<2x8x128xf32, #tpu.memory_space<vmem>>, vector<1x8x128xf32>
    %91 = vector.shape_cast %90 : vector<1x8x128xf32> to vector<8x128xf32>
    %92 = vector.shape_cast %42 : vector<8x128xf32> to vector<1x8x128xf32>
    tpu.vector_store %arg16[%c0_43, %c0_44, %c0_45], %92 {strides = array<i32>} : memref<2x8x128xf32, #tpu.memory_space<vmem>>, vector<1x8x128xf32>,
    %c1_46 = arith.constant 1 : index
    %c0_47 = arith.constant 0 : index
    %c0_48 = arith.constant 0 : index
    %93 = vector.load %arg16[%c1_46, %c0_47, %c0_48] : memref<2x8x128xf32, #tpu.memory_space<vmem>>, vector<1x8x128xf32>
    %94 = vector.shape_cast %93 : vector<1x8x128xf32> to vector<8x128xf32>
    %95 = vector.shape_cast %81 : vector<8x128xf32> to vector<1x8x128xf32>
    tpu.vector_store %arg16[%c1_46, %c0_47, %c0_48], %95 {strides = array<i32>} : memref<2x8x128xf32, #tpu.memory_space<vmem>>, vector<1x8x128xf32>,
    %96 = arith.truncf %83 : vector<8x128xf32> to vector<8x128xbf16>
    %c0_49 = arith.constant 0 : index
    %c0_50 = arith.constant 0 : index
    %97 = vector.load %arg9[%c0_49, %c0_50] : memref<128x128xbf16, #tpu.memory_space<vmem>>, vector<128x128xbf16>
    %cst_51 = arith.constant dense<0.000000e+00> : vector<8x128xf32>
    %98 = tpu.matmul %96, %97, %cst_51 {dimension_numbers = #tpu.dot_dimension_numbers<[1], [0], [0], [1], [0, 0, 1, 1], [], []>} : vector<8x128xbf16>, vector<128x128xbf16>, vector<8x128xf32> -> vector<8x128xf32>
    %c0_52 = arith.constant 0 : index
    %c0_53 = arith.constant 0 : index
    %99 = vector.load %arg10[%c0_52, %c0_53] : memref<1x128xf32, #tpu.memory_space<vmem>>, vector<1x128xf32>
    %100 = vector.broadcast %99 : vector<1x128xf32> to vector<8x128xf32>
    %101 = arith.addf %98, %100 : vector<8x128xf32>
    %c0_54 = arith.constant 0 : index
    %c0_55 = arith.constant 0 : index
    %c0_56 = arith.constant 0 : index
    %102 = vector.load %arg14[%c0_54, %c0_55, %c0_56] : memref<1x8x128xf32, #tpu.memory_space<vmem>>, vector<1x8x128xf32>
    %103 = vector.shape_cast %102 : vector<1x8x128xf32> to vector<8x128xf32>
    %104 = vector.shape_cast %101 : vector<8x128xf32> to vector<1x8x128xf32>
    tpu.vector_store %arg14[%c0_54, %c0_55, %c0_56], %104 {strides = array<i32>} : memref<1x8x128xf32, #tpu.memory_space<vmem>>, vector<1x8x128xf32>,
    %105 = tpu.iota {dimensions = array<i32: 1>} : vector<8x128xi32>
    %cst_57 = arith.constant dense<0xFF800000> : vector<8xf32>
    %106 = vector.multi_reduction <maximumf>, %101, %cst_57 [1] : vector<8x128xf32> to vector<8xf32>
    %107 = vector.shape_cast %106 : vector<8xf32> to vector<8x1xf32>
    %108 = vector.broadcast %107 : vector<8x1xf32> to vector<8x128xf32>
    %109 = arith.cmpf oeq, %101, %108 : vector<8x128xf32>
    %c128_i32 = arith.constant 128 : i32
    %110 = vector.broadcast %c128_i32 : i32 to vector<8x128xi32>
    %111 = arith.select %109, %105, %110 : vector<8x128xi1>, vector<8x128xi32>
    %cst_58 = arith.constant dense<2147483647> : vector<8xi32>
    %112 = vector.multi_reduction <minsi>, %111, %cst_58 [1] : vector<8x128xi32> to vector<8xi32>
    %113 = vector.shape_cast %112 : vector<8xi32> to vector<8x1xi32>
    %114 = vector.broadcast %113 : vector<8x1xi32> to vector<8x128xi32>
    %115 = arith.cmpi eq, %105, %114 : vector<8x128xi32>
    %116 = arith.extui %115 : vector<8x128xi1> to vector<8x128xi32>
    %117 = arith.sitofp %116 : vector<8x128xi32> to vector<8x128xf32>
    %118 = arith.truncf %117 : vector<8x128xf32> to vector<8x128xbf16>
    %119 = arith.index_cast %arg0 : i32 to index
    %120 = memref.load %arg1[%119] : memref<7xi32, #tpu.memory_space<smem>>
    %c0_i32_59 = arith.constant 0 : i32
    %121 = arith.cmpi sgt, %120, %c0_i32_59 : i32
    %c1_i32 = arith.constant 1 : i32
    %122 = arith.addi %arg0, %c1_i32 : i32
    %123 = arith.index_cast %122 : i32 to index
    %c0_60 = arith.constant 0 : index
    %c0_61 = arith.constant 0 : index
    %124 = vector.load %arg11[%123, %c0_60, %c0_61] : memref<8x8x128xbf16, #tpu.memory_space<vmem>>, vector<1x8x128xbf16>
    %125 = vector.shape_cast %124 : vector<1x8x128xbf16> to vector<8x128xbf16>
    %126 = arith.select %121, %125, %118 : vector<8x128xbf16>
    %c0_62 = arith.constant 0 : index
    %c0_63 = arith.constant 0 : index
    %127 = vector.load %arg17[%c0_62, %c0_63] : memref<8x128xbf16, #tpu.memory_space<vmem>>, vector<8x128xbf16>
    tpu.vector_store %arg17[%c0_62, %c0_63], %126 {strides = array<i32>} : memref<8x128xbf16, #tpu.memory_space<vmem>>, vector<8x128xbf16>,
    return
  }
  func.func @transform_0(%arg0: i32) -> i32 {
    %c0_i32 = arith.constant 0 : i32
    %c0_i32_0 = arith.constant 0 : i32
    return %c0_i32 : i32
  }
  func.func @transform_1(%arg0: i32) -> (i32, i32) {
    %c0_i32 = arith.constant 0 : i32
    %c0_i32_0 = arith.constant 0 : i32
    %c0_i32_1 = arith.constant 0 : i32
    return %c0_i32, %c0_i32_0 : i32, i32
  }
  func.func @transform_2(%arg0: i32) -> (i32, i32) {
    %c0_i32 = arith.constant 0 : i32
    %c0_i32_0 = arith.constant 0 : i32
    %c0_i32_1 = arith.constant 0 : i32
    return %c0_i32, %c0_i32_0 : i32, i32
  }
  func.func @transform_3(%arg0: i32) -> (i32, i32) {
    %c0_i32 = arith.constant 0 : i32
    %c0_i32_0 = arith.constant 0 : i32
    %c0_i32_1 = arith.constant 0 : i32
    return %c0_i32, %c0_i32_0 : i32, i32
  }
  func.func @transform_4(%arg0: i32) -> (i32, i32) {
    %c0_i32 = arith.constant 0 : i32
    %c0_i32_0 = arith.constant 0 : i32
    %c0_i32_1 = arith.constant 0 : i32
    return %c0_i32, %c0_i32_0 : i32, i32
  }
  func.func @transform_5(%arg0: i32) -> (i32, i32) {
    %c0_i32 = arith.constant 0 : i32
    %c0_i32_0 = arith.constant 0 : i32
    %c0_i32_1 = arith.constant 0 : i32
    return %c0_i32, %c0_i32_0 : i32, i32
  }
  func.func @transform_6(%arg0: i32) -> (i32, i32) {
    %c0_i32 = arith.constant 0 : i32
    %c0_i32_0 = arith.constant 0 : i32
    %c0_i32_1 = arith.constant 0 : i32
    return %c0_i32, %c0_i32_0 : i32, i32
  }
  func.func @transform_7(%arg0: i32) -> (i32, i32) {
    %c0_i32 = arith.constant 0 : i32
    %c0_i32_0 = arith.constant 0 : i32
    %c0_i32_1 = arith.constant 0 : i32
    return %c0_i32, %c0_i32_0 : i32, i32
  }
  func.func @transform_8(%arg0: i32) -> (i32, i32) {
    %c0_i32 = arith.constant 0 : i32
    %c0_i32_0 = arith.constant 0 : i32
    %c0_i32_1 = arith.constant 0 : i32
    return %c0_i32, %c0_i32_0 : i32, i32
  }
  func.func @transform_9(%arg0: i32) -> (i32, i32) {
    %c0_i32 = arith.constant 0 : i32
    %c0_i32_0 = arith.constant 0 : i32
    %c0_i32_1 = arith.constant 0 : i32
    return %c0_i32, %c0_i32_0 : i32, i32
  }
  func.func @transform_10(%arg0: i32) -> (i32, i32, i32) {
    %c0_i32 = arith.constant 0 : i32
    %c0_i32_0 = arith.constant 0 : i32
    %c0_i32_1 = arith.constant 0 : i32
    %c0_i32_2 = arith.constant 0 : i32
    return %c0_i32, %c0_i32_0, %c0_i32_1 : i32, i32, i32
  }
  func.func @transform_11(%arg0: i32) -> (i32, i32, i32) {
    %c0_i32 = arith.constant 0 : i32
    %c0_i32_0 = arith.constant 0 : i32
    %c0_i32_1 = arith.constant 0 : i32
    %c0_i32_2 = arith.constant 0 : i32
    return %c0_i32, %c0_i32_0, %c0_i32_1 : i32, i32, i32
  }
  func.func @transform_12(%arg0: i32) -> (i32, i32, i32) {
    %c0_i32 = arith.constant 0 : i32
    %c0_i32_0 = arith.constant 0 : i32
    %c0_i32_1 = arith.constant 0 : i32
    %c0_i32_2 = arith.constant 0 : i32
    return %c0_i32, %c0_i32_0, %c0_i32_1 : i32, i32, i32
  }
  func.func @transform_13(%arg0: i32) -> (i32, i32, i32) {
    %c0_i32 = arith.constant 0 : i32
    %c0_i32_0 = arith.constant 0 : i32
    %c0_i32_1 = arith.constant 0 : i32
    return %arg0, %c0_i32, %c0_i32_0 : i32, i32, i32
  }
}

</mosaic_0001>

<bundles_post_ra>
// kernel: seq2seq_forward.3
= control target key start
LH: loop header
LB: loop body
LE: loop exit
PB: predicated region body
PF: predicated region fallthrough
CT: control target
= control target key end

     0   :  { %v532_v1 = vmov 0   ;;  %v57_v37 = vlaneseq  ;;  %s808_s1 = inlined_call_operand.vmem [shape: bf16[128,512], index: 1, kind: input, shape index: {}]   ;;  %s809_s0 = inlined_call_operand.vmem [shape: bf16[64,128], index: 0, kind: input, shape index: {}]   ;;  %s810_s2 = inlined_call_operand.vmem [shape: f32[1,512], index: 2, kind: input, shape index: {}]   ;;  %s811_s3 = inlined_call_operand.vmem [shape: f32[64,512], index: 3, kind: output, shape index: {}]  }
   0x1   :  { %v480_v0 = vld [vmem:[%s808_s1 + $0x4] ss:$16 sps:$4 sm:$0xff]   ;;  %293 = vmatprep.mubr.bf16.mxu0 %v532_v1  ;;  %366 = vmatprep.mubr.bf16.mxu1 %v532_v1  ;;  %v482_v2 = vld [vmem:[%s808_s1 + $0xc] ss:$16 sps:$4 sm:$0xff]   ;;  %v484_v3 = vld [vmem:[%s808_s1] ss:$16 sps:$4 sm:$0xff]  }
   0x2   :  { %261 = vmatprep.subr.bf16.mxu0 %v480_v0  ;;  %v485_v4 = vld [vmem:[%s808_s1 + $0x8] ss:$16 sps:$4 sm:$0xff]   ;;  %334 = vmatprep.subr.bf16.mxu1 %v482_v2  ;;  %v486_v5 = vld [vmem:[%s808_s1 + $0x24] ss:$16 sps:$4 sm:$0xff]   ;;  %v488_v6 = vld [vmem:[%s808_s1 + $0x2c] ss:$16 sps:$4 sm:$0xff]  }
   0x3   :  { %262 = vmatpush1.bf16.msra.mxu0 %v484_v3  ;;  %335 = vmatpush1.bf16.msra.mxu1 %v485_v4  ;;  %v490_v7 = vld [vmem:[%s808_s1 + $0x20] ss:$16 sps:$4 sm:$0xff]   ;;  %v491_v8 = vld [vmem:[%s808_s1 + $0x28] ss:$16 sps:$4 sm:$0xff]   ;;  %v492_v9 = vld [vmem:[%s808_s1 + $0x44] ss:$16 sps:$4 sm:$0xff]  }
   0x4   :  { %263 = vmatprep.subr.bf16.mxu0 %v486_v5  ;;  %336 = vmatprep.subr.bf16.mxu1 %v488_v6  ;;  %v494_v10 = vld [vmem:[%s808_s1 + $0x4c] ss:$16 sps:$4 sm:$0xff]   ;;  %v496_v11 = vld [vmem:[%s808_s1 + $0x40] ss:$16 sps:$4 sm:$0xff]   ;;  %v497_v12 = vld [vmem:[%s808_s1 + $0x48] ss:$16 sps:$4 sm:$0xff]  }
   0x5   :  { %v498_v13 = vld [vmem:[%s808_s1 + $0x64] ss:$16 sps:$4 sm:$0xff]   ;;  %v500_v14 = vld [vmem:[%s808_s1 + $0x6c] ss:$16 sps:$4 sm:$0xff]   ;;  %v502_v15 = vld [vmem:[%s808_s1 + $0x60] ss:$16 sps:$4 sm:$0xff]  }
   0x6   :  { %v503_v16 = vld [vmem:[%s808_s1 + $0x68] ss:$16 sps:$4 sm:$0xff]   ;;  %v504_v17 = vld [vmem:[%s808_s1 + $0x84] ss:$16 sps:$4 sm:$0xff]   ;;  %v506_v18 = vld [vmem:[%s808_s1 + $0x8c] ss:$16 sps:$4 sm:$0xff]  }
   0x7   :  { %264 = vmatpush1.bf16.msra.mxu0 %v490_v7  ;;  %337 = vmatpush1.bf16.msra.mxu1 %v491_v8  ;;  %v508_v19 = vld [vmem:[%s808_s1 + $0x80] ss:$16 sps:$4 sm:$0xff]   ;;  %v509_v20 = vld [vmem:[%s808_s1 + $0x88] ss:$16 sps:$4 sm:$0xff]   ;;  %v510_v21 = vld [vmem:[%s808_s1 + $0xa4] ss:$16 sps:$4 sm:$0xff]  }
   0x8   :  { %265 = vmatprep.subr.bf16.mxu0 %v492_v9  ;;  %338 = vmatprep.subr.bf16.mxu1 %v494_v10  ;;  %v512_v22 = vld [vmem:[%s808_s1 + $0xac] ss:$16 sps:$4 sm:$0xff]   ;;  %v514_v23 = vld [vmem:[%s808_s1 + $0xa0] ss:$16 sps:$4 sm:$0xff]   ;;  %v515_v24 = vld [vmem:[%s808_s1 + $0xa8] ss:$16 sps:$4 sm:$0xff]  }
   0x9   :  { %v516_v25 = vld [vmem:[%s808_s1 + $0xc4] ss:$16 sps:$4 sm:$0xff]   ;;  %v518_v26 = vld [vmem:[%s808_s1 + $0xcc] ss:$16 sps:$4 sm:$0xff]   ;;  %v520_v27 = vld [vmem:[%s808_s1 + $0xc0] ss:$16 sps:$4 sm:$0xff]  }
   0xa   :  { %v521_v28 = vld [vmem:[%s808_s1 + $0xc8] ss:$16 sps:$4 sm:$0xff]   ;;  %v522_v29 = vld [vmem:[%s808_s1 + $0xe4] ss:$16 sps:$4 sm:$0xff]   ;;  %v524_v30 = vld [vmem:[%s808_s1 + $0xec] ss:$16 sps:$4 sm:$0xff]  }
   0xb   :  { %266 = vmatpush1.bf16.msra.mxu0 %v496_v11  ;;  %339 = vmatpush1.bf16.msra.mxu1 %v497_v12  ;;  %v526_v31 = vld [vmem:[%s808_s1 + $0xe0] ss:$16 sps:$4 sm:$0xff]   ;;  %v527_v32 = vld [vmem:[%s808_s1 + $0xe8] ss:$16 sps:$4 sm:$0xff]   ;;  %v58_v38 = vshrl.u32 %v57_v37, 7 }
   0xc   :  { %267 = vmatprep.subr.bf16.mxu0 %v498_v13  ;;  %340 = vmatprep.subr.bf16.mxu1 %v500_v14  ;;  %v528_v33 = vld [vmem:[%s809_s0] sm:$0xff]   ;;  %v529_v34 = vld [vmem:[%s809_s0 + $0x8] sm:$0xff]   ;;  %v530_v35 = vld [vmem:[%s809_s0 + $0x10] sm:$0xff]  }
   0xd   :  { %v531_v36 = vld [vmem:[%s809_s0 + $0x18] sm:$0xff]   ;;  %v59_v39 = vsub.s32 0, %v58_v38  ;;  %v67_v40 = vsub.s32 2, %v58_v38  ;;  %v55_v41 = vld [vmem:[%s810_s2] sm:$0xf]  ;;  %v63_v42 = vsub.s32 1, %v58_v38 }
   0xe   :  { %v71_v43 = vsub.s32 3, %v58_v38 }
   0xf   :  { %268 = vmatpush1.bf16.msra.mxu0 %v502_v15  ;;  %341 = vmatpush1.bf16.msra.mxu1 %v503_v16  ;;  %v672_v44 = vrot.slane %v55_v41, %v59_v39  ;;  %v674_v45 = vrot.slane %v55_v41, %v67_v40  ;;  %v676_v46 = vrot.slane %v55_v41, %v63_v42 }
  0x10   :  { %269 = vmatprep.subr.bf16.mxu0 %v504_v17  ;;  %342 = vmatprep.subr.bf16.mxu1 %v506_v18  ;;  %v678_v47 = vrot.slane %v55_v41, %v71_v43 }
  0x13   :  { %270 = vmatpush1.bf16.msra.mxu0 %v508_v19  ;;  %343 = vmatpush1.bf16.msra.mxu1 %v509_v20 }
  0x14   :  { %271 = vmatprep.subr.bf16.mxu0 %v510_v21  ;;  %344 = vmatprep.subr.bf16.mxu1 %v512_v22 }
  0x17   :  { %272 = vmatpush1.bf16.msra.mxu0 %v514_v23  ;;  %345 = vmatpush1.bf16.msra.mxu1 %v515_v24 }
  0x18   :  { %273 = vmatprep.subr.bf16.mxu0 %v516_v25  ;;  %346 = vmatprep.subr.bf16.mxu1 %v518_v26 }
  0x1b   :  { %274 = vmatpush1.bf16.msra.mxu0 %v520_v27  ;;  %347 = vmatpush1.bf16.msra.mxu1 %v521_v28 }
  0x1c   :  { %275 = vmatprep.subr.bf16.mxu0 %v522_v29  ;;  %348 = vmatprep.subr.bf16.mxu1 %v524_v30 }
  0x1f   :  { %276 = vmatpush1.bf16.msra.mxu0 %v526_v31  ;;  %349 = vmatpush1.bf16.msra.mxu1 %v527_v32 }
  0x22   :  { %294 = vmatmul.mubr.bf16.vlgmr.msra.gmra.mrb[0].mxu0 %v528_v33  ;;  %367 = vmatmul.mubr.bf16.vlgmr.msra.gmra.mrb[0].mxu1 %v528_v33 }
  0x23   :  { %303 = vmatprep.mubr.bf16.mxu0 %v532_v1  ;;  %376 = vmatprep.mubr.bf16.mxu1 %v532_v1 }
  0x2a   :  { %304 = vmatmul.mubr.bf16.gmra.mrb[4].mxu0 %v529_v34  ;;  %377 = vmatmul.mubr.bf16.gmra.mrb[4].mxu1 %v529_v34 }
  0x2b   :  { %313 = vmatprep.mubr.bf16.mxu0 %v532_v1  ;;  %386 = vmatprep.mubr.bf16.mxu1 %v532_v1 }
  0x32   :  { %314 = vmatmul.mubr.bf16.gmra.mrb[8].mxu0 %v530_v35  ;;  %387 = vmatmul.mubr.bf16.gmra.mrb[8].mxu1 %v530_v35 }
  0x33   :  { %323 = vmatprep.mubr.bf16.mxu0 %v532_v1  ;;  %396 = vmatprep.mubr.bf16.mxu1 %v532_v1 }
  0x3a   :  { %324 = vmatmul.mubr.bf16.gmra.mrb[12].mxu0 %v531_v36  ;;  %397 = vmatmul.mubr.bf16.gmra.mrb[12].mxu1 %v531_v36 }
  0xf5   :  { %v295_v48 = vpop.f32.mrb[0].mxu0  ;;  %v368_v49 = vpop.f32.mrb[0].mxu1 }
  0xf6   :  { %v296_v50 = vadd.f32 %v295_v48, %v672_v44  ;;  %v369_v51 = vadd.f32 %v368_v49, %v674_v45  ;;  %v297_v52 = vpop.f32.mrb[1].mxu0  ;;  %v370_v53 = vpop.f32.mrb[1].mxu1 }
  0xf7   :  { %v298_v54 = vadd.f32 %v297_v52, %v676_v46  ;;  %v371_v55 = vadd.f32 %v370_v53, %v678_v47  ;;  %v299_v56 = vpop.f32.mrb[2].mxu0  ;;  %v372_v57 = vpop.f32.mrb[2].mxu1 }
  0xf8   :  { %407 = vst [vmem:[%s811_s3] sm:$0xff] %v296_v50  ;;  %409 = vst [vmem:[%s811_s3 + $0x10] sm:$0xff] %v369_v51  ;;  %v300_v58 = vadd.f32 %v299_v56, %v672_v44  ;;  %v373_v59 = vadd.f32 %v372_v57, %v674_v45  ;;  %v301_v60 = vpop.f32.mrb[3].mxu0  ;;  %v374_v61 = vpop.f32.mrb[3].mxu1 }
  0xf9   :  { %408 = vst [vmem:[%s811_s3 + $0x8] sm:$0xff] %v298_v54  ;;  %410 = vst [vmem:[%s811_s3 + $0x18] sm:$0xff] %v371_v55  ;;  %v302_v62 = vadd.f32 %v301_v60, %v676_v46  ;;  %v375_v63 = vadd.f32 %v374_v61, %v678_v47 }
  0xfa   :  { %411 = vst [vmem:[%s811_s3 + $0x20] sm:$0xff] %v300_v58  ;;  %413 = vst [vmem:[%s811_s3 + $0x30] sm:$0xff] %v373_v59 }
  0xfb   :  { %412 = vst [vmem:[%s811_s3 + $0x28] sm:$0xff] %v302_v62  ;;  %414 = vst [vmem:[%s811_s3 + $0x38] sm:$0xff] %v375_v63 }
  0xfd   :  { %v305_v0 = vpop.f32.mrb[4].mxu0  ;;  %v378_v1 = vpop.f32.mrb[4].mxu1 }
  0xfe   :  { %v306_v2 = vadd.f32 %v305_v0, %v672_v44  ;;  %v379_v3 = vadd.f32 %v378_v1, %v674_v45  ;;  %v307_v4 = vpop.f32.mrb[5].mxu0  ;;  %v380_v5 = vpop.f32.mrb[5].mxu1 }
  0xff   :  { %v308_v6 = vadd.f32 %v307_v4, %v676_v46  ;;  %v381_v7 = vadd.f32 %v380_v5, %v678_v47  ;;  %v309_v8 = vpop.f32.mrb[6].mxu0  ;;  %v382_v9 = vpop.f32.mrb[6].mxu1 }
 0x100   :  { %415 = vst [vmem:[%s811_s3 + $0x40] sm:$0xff] %v306_v2  ;;  %417 = vst [vmem:[%s811_s3 + $0x50] sm:$0xff] %v379_v3  ;;  %v310_v10 = vadd.f32 %v309_v8, %v672_v44  ;;  %v383_v11 = vadd.f32 %v382_v9, %v674_v45  ;;  %v311_v12 = vpop.f32.mrb[7].mxu0  ;;  %v384_v13 = vpop.f32.mrb[7].mxu1 }
 0x101   :  { %416 = vst [vmem:[%s811_s3 + $0x48] sm:$0xff] %v308_v6  ;;  %418 = vst [vmem:[%s811_s3 + $0x58] sm:$0xff] %v381_v7  ;;  %v312_v14 = vadd.f32 %v311_v12, %v676_v46  ;;  %v385_v15 = vadd.f32 %v384_v13, %v678_v47 }
 0x102   :  { %419 = vst [vmem:[%s811_s3 + $0x60] sm:$0xff] %v310_v10  ;;  %421 = vst [vmem:[%s811_s3 + $0x70] sm:$0xff] %v383_v11 }
 0x103   :  { %420 = vst [vmem:[%s811_s3 + $0x68] sm:$0xff] %v312_v14  ;;  %422 = vst [vmem:[%s811_s3 + $0x78] sm:$0xff] %v385_v15 }
 0x105   :  { %v315_v16 = vpop.f32.mrb[8].mxu0  ;;  %v388_v17 = vpop.f32.mrb[8].mxu1 }
 0x106   :  { %v316_v18 = vadd.f32 %v315_v16, %v672_v44  ;;  %v389_v19 = vadd.f32 %v388_v17, %v674_v45  ;;  %v317_v20 = vpop.f32.mrb[9].mxu0  ;;  %v390_v21 = vpop.f32.mrb[9].mxu1 }
 0x107   :  { %v318_v22 = vadd.f32 %v317_v20, %v676_v46  ;;  %v391_v23 = vadd.f32 %v390_v21, %v678_v47  ;;  %v319_v24 = vpop.f32.mrb[10].mxu0  ;;  %v392_v25 = vpop.f32.mrb[10].mxu1 }
 0x108   :  { %423 = vst [vmem:[%s811_s3 + $0x80] sm:$0xff] %v316_v18  ;;  %425 = vst [vmem:[%s811_s3 + $0x90] sm:$0xff] %v389_v19  ;;  %v320_v26 = vadd.f32 %v319_v24, %v672_v44  ;;  %v393_v27 = vadd.f32 %v392_v25, %v674_v45  ;;  %v321_v28 = vpop.f32.mrb[11].mxu0  ;;  %v394_v29 = vpop.f32.mrb[11].mxu1 }
 0x109   :  { %424 = vst [vmem:[%s811_s3 + $0x88] sm:$0xff] %v318_v22  ;;  %426 = vst [vmem:[%s811_s3 + $0x98] sm:$0xff] %v391_v23  ;;  %v322_v30 = vadd.f32 %v321_v28, %v676_v46  ;;  %v395_v31 = vadd.f32 %v394_v29, %v678_v47 }
 0x10a   :  { %427 = vst [vmem:[%s811_s3 + $0xa0] sm:$0xff] %v320_v26  ;;  %429 = vst [vmem:[%s811_s3 + $0xb0] sm:$0xff] %v393_v27 }
 0x10b   :  { %428 = vst [vmem:[%s811_s3 + $0xa8] sm:$0xff] %v322_v30  ;;  %430 = vst [vmem:[%s811_s3 + $0xb8] sm:$0xff] %v395_v31 }
 0x10d   :  { %v325_v32 = vpop.f32.mrb[12].mxu0  ;;  %v398_v33 = vpop.f32.mrb[12].mxu1 }
 0x10e   :  { %v326_v34 = vadd.f32 %v325_v32, %v672_v44  ;;  %v399_v35 = vadd.f32 %v398_v33, %v674_v45  ;;  %v327_v36 = vpop.f32.mrb[13].mxu0  ;;  %v400_v37 = vpop.f32.mrb[13].mxu1 }
 0x10f   :  { %v328_v38 = vadd.f32 %v327_v36, %v676_v46  ;;  %v401_v39 = vadd.f32 %v400_v37, %v678_v47  ;;  %v329_v40 = vpop.f32.mrb[14].mxu0  ;;  %v402_v41 = vpop.f32.mrb[14].mxu1 }
 0x110   :  { %431 = vst [vmem:[%s811_s3 + $0xc0] sm:$0xff] %v326_v34  ;;  %433 = vst [vmem:[%s811_s3 + $0xd0] sm:$0xff] %v399_v35  ;;  %v330_v42 = vadd.f32 %v329_v40, %v672_v44  ;;  %v403_v43 = vadd.f32 %v402_v41, %v674_v45  ;;  %v331_v48 = vpop.f32.mrb[15].mxu0  ;;  %v404_v49 = vpop.f32.mrb[15].mxu1 }
 0x111   :  { %432 = vst [vmem:[%s811_s3 + $0xc8] sm:$0xff] %v328_v38  ;;  %434 = vst [vmem:[%s811_s3 + $0xd8] sm:$0xff] %v401_v39  ;;  %v332_v50 = vadd.f32 %v331_v48, %v676_v46  ;;  %v405_v51 = vadd.f32 %v404_v49, %v678_v47 }
 0x112   :  { %435 = vst [vmem:[%s811_s3 + $0xe0] sm:$0xff] %v330_v42  ;;  %437 = vst [vmem:[%s811_s3 + $0xf0] sm:$0xff] %v403_v43 }
 0x113   :  { %436 = vst [vmem:[%s811_s3 + $0xe8] sm:$0xff] %v332_v50  ;;  %438 = vst [vmem:[%s811_s3 + $0xf8] sm:$0xff] %v405_v51 }

// kernel: seq2seq_forward.4
= control target key start
LH: loop header
LB: loop body
LE: loop exit
PB: predicated region body
PF: predicated region fallthrough
CT: control target
= control target key end

     0   :  { %s1542_s21 = smov 0   ;;  %s1895_s0 = inlined_call_operand.vmem [shape: f32[8,8,512], index: 0, kind: input, shape index: {}]   ;;  %s1896_s1 = inlined_call_operand.vmem [shape: bf16[128,512], index: 1, kind: input, shape index: {}]   ;;  %s1897_s2 = inlined_call_operand.vmem [shape: bf16[128,512], index: 2, kind: input, shape index: {}]   ;;  %s1898_s3 = inlined_call_operand.vmem [shape: bf16[128,512], index: 3, kind: input, shape index: {}]   ;;  %s1899_s4 = inlined_call_operand.vmem [shape: f32[1,512], index: 4, kind: input, shape index: {}]   ;;  %s1900_s5 = inlined_call_operand.vmem [shape: f32[2,8,128], index: 5, kind: output, shape index: {0}]   ;;  %s1901_s6 = inlined_call_operand.vmem [shape: f32[2,8,128], index: 6, kind: output, shape index: {1}]  }
   0x1 LB: > { %s1195_s22 = sadd.s32 4294967295, %s1503_s21   ;;  %p1198_p0 = scmp.ge.s32.totalorder %s1503_s21, 1  ;;  %s1503_s21 = sphi %s1542_s21, %s17_s21  }
   0x2   : > { %p205_p1 = scmp.lt.s32.totalorder %s1503_s21, 9 }
   0x4   : > { %p206_p2 = pnand %p1198_p0, %p205_p1 }
   0x5   : > { %p230_p3 = scmp.lt.s32.totalorder (!%p206_p2), %s1195_s22, 7  ;;  %p1201_p4 = scmp.ne.s32.totalorder (!%p206_p2), %s1195_s22, 0 }
   0x6   : > { %209 = sbr.rel (%p206_p2) target bundleno = 576 (0x240), region = 40 }
   0xd   : > { %s231_s23 = scalar_select %p230_p3, %s1195_s22, 7 }
   0xe   : > { %239 = sbr.rel (%p1201_p4) target bundleno = 21 (0x15), region = 44  ;;  %v1505_v0 = vmov (!%p1201_p4), 0.0  }
   0xf   : > { %s1310_s24 = sshll.u32 %s231_s23, 5  ;;  %240 = vst [vmem:[%s1900_s5] sm:$0xff] (!%p1201_p4), %v1505_v0  ;;  %241 = vst [vmem:[%s1900_s5 + $0x8] sm:$0xff] (!%p1201_p4), %v1505_v0 }
  0x10   : > { %s1553_s27 = scalar_lea.vmem %s1895_s0, %s1310_s24  ;;  %242 = vst [vmem:[%s1901_s6] sm:$0xff] (!%p1201_p4), %v1505_v0  ;;  %243 = vst [vmem:[%s1901_s6 + $0x8] sm:$0xff] (!%p1201_p4), %v1505_v0 }
  0x15 PF: > { %v1321_v1 = vld [vmem:[%s1896_s1 + $0x4] ss:$16 sps:$4 sm:$0xff]   ;;  %v1323_v2 = vld [vmem:[%s1896_s1] ss:$16 sps:$4 sm:$0xff]   ;;  %v1506_v3 = vmov 0  }
  0x16   : > { %474 = vmatprep.mubr.bf16.mxu0 %v1506_v3  ;;  %515 = vmatprep.mubr.bf16.mxu1 %v1506_v3  ;;  %v1324_v4 = vld [vmem:[%s1896_s1 + $0x24] ss:$16 sps:$4 sm:$0xff]   ;;  %v1326_v5 = vld [vmem:[%s1896_s1 + $0x20] ss:$16 sps:$4 sm:$0xff]   ;;  %v1332_v7 = vld [vmem:[%s1896_s1 + $0xc] ss:$16 sps:$4 sm:$0xff]  }
  0x17   : > { %442 = vmatprep.subr.bf16.mxu0 %v1321_v1  ;;  %v1327_v6 = vld [vmem:[%s1896_s1 + $0x44] ss:$16 sps:$4 sm:$0xff]   ;;  %v1335_v8 = vld [vmem:[%s1896_s1 + $0x8] ss:$16 sps:$4 sm:$0xff]   ;;  %v1329_v9 = vld [vmem:[%s1896_s1 + $0x40] ss:$16 sps:$4 sm:$0xff]   ;;  %483 = vmatprep.subr.bf16.mxu1 %v1332_v7 }
  0x18   : > { %443 = vmatpush1.bf16.msra.mxu0 %v1323_v2  ;;  %v1330_v10 = vld [vmem:[%s1896_s1 + $0x64] ss:$16 sps:$4 sm:$0xff]   ;;  %484 = vmatpush1.bf16.msra.mxu1 %v1335_v8  ;;  %v1338_v11 = vld [vmem:[%s1896_s1 + $0x2c] ss:$16 sps:$4 sm:$0xff]   ;;  %v1341_v12 = vld [vmem:[%s1896_s1 + $0x28] ss:$16 sps:$4 sm:$0xff]  }
  0x19   : > { %444 = vmatprep.subr.bf16.mxu0 %v1324_v4  ;;  %485 = vmatprep.subr.bf16.mxu1 %v1338_v11  ;;  %v1334_v13 = vld [vmem:[%s1896_s1 + $0x60] ss:$16 sps:$4 sm:$0xff]   ;;  %v1336_v14 = vld [vmem:[%s1896_s1 + $0x84] ss:$16 sps:$4 sm:$0xff]   ;;  %v1344_v15 = vld [vmem:[%s1896_s1 + $0x4c] ss:$16 sps:$4 sm:$0xff]  }
  0x1a   : > { %v1347_v16 = vld [vmem:[%s1896_s1 + $0x48] ss:$16 sps:$4 sm:$0xff]   ;;  %v1350_v17 = vld [vmem:[%s1896_s1 + $0x6c] ss:$16 sps:$4 sm:$0xff]   ;;  %v1340_v18 = vld [vmem:[%s1896_s1 + $0x80] ss:$16 sps:$4 sm:$0xff]  }
  0x1b   : > { %v1342_v19 = vld [vmem:[%s1896_s1 + $0xa4] ss:$16 sps:$4 sm:$0xff]   ;;  %v1353_v20 = vld [vmem:[%s1896_s1 + $0x68] ss:$16 sps:$4 sm:$0xff]   ;;  %v1356_v21 = vld [vmem:[%s1896_s1 + $0x8c] ss:$16 sps:$4 sm:$0xff]  }
  0x1c   : > { %445 = vmatpush1.bf16.msra.mxu0 %v1326_v5  ;;  %486 = vmatpush1.bf16.msra.mxu1 %v1341_v12  ;;  %v1346_v22 = vld [vmem:[%s1896_s1 + $0xa0] ss:$16 sps:$4 sm:$0xff]   ;;  %v1348_v23 = vld [vmem:[%s1896_s1 + $0xc4] ss:$16 sps:$4 sm:$0xff]   ;;  %v1359_v24 = vld [vmem:[%s1896_s1 + $0x88] ss:$16 sps:$4 sm:$0xff]  }
  0x1d   : > { %446 = vmatprep.subr.bf16.mxu0 %v1327_v6  ;;  %487 = vmatprep.subr.bf16.mxu1 %v1344_v15  ;;  %v1360_v25 = vld [vmem:[%s1896_s1 + $0xac] ss:$16 sps:$4 sm:$0xff]   ;;  %v1352_v26 = vld [vmem:[%s1896_s1 + $0xc0] ss:$16 sps:$4 sm:$0xff]   ;;  %v1354_v27 = vld [vmem:[%s1896_s1 + $0xe4] ss:$16 sps:$4 sm:$0xff]  }
  0x1e   : > { %v1362_v28 = vld [vmem:[%s1896_s1 + $0xa8] ss:$16 sps:$4 sm:$0xff]   ;;  %v1363_v29 = vld [vmem:[%s1896_s1 + $0xcc] ss:$16 sps:$4 sm:$0xff]   ;;  %v1358_v30 = vld [vmem:[%s1896_s1 + $0xe0] ss:$16 sps:$4 sm:$0xff]  }
  0x1f   : > { %v248_v31 = vld [vmem:[%s1900_s5] sm:$0xff]  ;;  %v1365_v32 = vld [vmem:[%s1896_s1 + $0xc8] ss:$16 sps:$4 sm:$0xff]   ;;  %v1366_v34 = vld [vmem:[%s1896_s1 + $0xec] ss:$16 sps:$4 sm:$0xff]  }
  0x20   : > { %447 = vmatpush1.bf16.msra.mxu0 %v1329_v9  ;;  %488 = vmatpush1.bf16.msra.mxu1 %v1347_v16  ;;  %v1371_v33 = vld [vmem:[%s1898_s3 + $0x4] ss:$16 sps:$4 sm:$0xff]   ;;  %v249_v35 = vpack.c.bf16 %v248_v31, %v248_v31  ;;  %v1368_v36 = vld [vmem:[%s1896_s1 + $0xe8] ss:$16 sps:$4 sm:$0xff]   ;;  %v1369_v37 = vld [vmem:[%s1898_s3] ss:$16 sps:$4 sm:$0xff]  }
  0x21   : > { %448 = vmatprep.subr.bf16.mxu0 %v1330_v10  ;;  %489 = vmatprep.subr.bf16.mxu1 %v1350_v17  ;;  %v1377_v38 = vld [vmem:[%s1898_s3 + $0x24] ss:$16 sps:$4 sm:$0xff]   ;;  %v1374_v39 = vld [vmem:[%s1898_s3 + $0xc] ss:$16 sps:$4 sm:$0xff]   ;;  %v1375_v40 = vld [vmem:[%s1898_s3 + $0x20] ss:$16 sps:$4 sm:$0xff]  }
  0x22   : > { %v1372_v41 = vld [vmem:[%s1898_s3 + $0x8] ss:$16 sps:$4 sm:$0xff]   ;;  %v1383_v42 = vld [vmem:[%s1898_s3 + $0x44] ss:$16 sps:$4 sm:$0xff]   ;;  %v1380_v43 = vld [vmem:[%s1898_s3 + $0x2c] ss:$16 sps:$4 sm:$0xff]  }
  0x23   : > { %v1381_v44 = vld [vmem:[%s1898_s3 + $0x40] ss:$16 sps:$4 sm:$0xff]   ;;  %v1378_v45 = vld [vmem:[%s1898_s3 + $0x28] ss:$16 sps:$4 sm:$0xff]   ;;  %v1389_v46 = vld [vmem:[%s1898_s3 + $0x64] ss:$16 sps:$4 sm:$0xff]  }
  0x24   : > { %449 = vmatpush1.bf16.msra.mxu0 %v1334_v13  ;;  %490 = vmatpush1.bf16.msra.mxu1 %v1353_v20  ;;  %v1386_v47 = vld [vmem:[%s1898_s3 + $0x4c] ss:$16 sps:$4 sm:$0xff]   ;;  %v1387_v48 = vld [vmem:[%s1898_s3 + $0x60] ss:$16 sps:$4 sm:$0xff]   ;;  %v1384_v49 = vld [vmem:[%s1898_s3 + $0x48] ss:$16 sps:$4 sm:$0xff]  }
  0x25   : > { %450 = vmatprep.subr.bf16.mxu0 %v1336_v14  ;;  %491 = vmatprep.subr.bf16.mxu1 %v1356_v21  ;;  %v1395_v50 = vld [vmem:[%s1898_s3 + $0x84] ss:$16 sps:$4 sm:$0xff]   ;;  %v1392_v51 = vld [vmem:[%s1898_s3 + $0x6c] ss:$16 sps:$4 sm:$0xff]   ;;  %v1393_v52 = vld [vmem:[%s1898_s3 + $0x80] ss:$16 sps:$4 sm:$0xff]  }
  0x26   : > { %v1390_v53 = vld [vmem:[%s1898_s3 + $0x68] ss:$16 sps:$4 sm:$0xff]   ;;  %v1398_v54 = vld [vmem:[%s1898_s3 + $0x8c] ss:$16 sps:$4 sm:$0xff]   ;;  %v1401_v56 = vld [vmem:[%s1898_s3 + $0xa4] ss:$16 sps:$4 sm:$0xff]  }
  0x27   : > { %v1396_v55 = vld [vmem:[%s1898_s3 + $0x88] ss:$16 sps:$4 sm:$0xff]   ;;  %v1399_v57 = vld [vmem:[%s1898_s3 + $0xa0] ss:$16 sps:$4 sm:$0xff]   ;;  %v1404_v58 = vld [vmem:[%s1898_s3 + $0xac] ss:$16 sps:$4 sm:$0xff]  }
  0x28   : > { %451 = vmatpush1.bf16.msra.mxu0 %v1340_v18  ;;  %492 = vmatpush1.bf16.msra.mxu1 %v1359_v24  ;;  %v1402_v59 = vld [vmem:[%s1898_s3 + $0xa8] ss:$16 sps:$4 sm:$0xff]   ;;  %v1407_v60 = vld [vmem:[%s1898_s3 + $0xc4] ss:$16 sps:$4 sm:$0xff]   ;;  %v1405_v61 = vld [vmem:[%s1898_s3 + $0xc0] ss:$16 sps:$4 sm:$0xff]  }
  0x29   : > { %452 = vmatprep.subr.bf16.mxu0 %v1342_v19  ;;  %493 = vmatprep.subr.bf16.mxu1 %v1360_v25  ;;  %v1410_v62 = vld [vmem:[%s1898_s3 + $0xcc] ss:$16 sps:$4 sm:$0xff]   ;;  %v1408_v63 = vld [vmem:[%s1898_s3 + $0xc8] ss:$16 sps:$4 sm:$0xff]   ;;  %v1413_v0 = vld [vmem:[%s1898_s3 + $0xe4] ss:$16 sps:$4 sm:$0xff]  }
  0x2a   : > { %v1411_v1 = vld [vmem:[%s1898_s3 + $0xe0] ss:$16 sps:$4 sm:$0xff]   ;;  %v1416_v2 = vld [vmem:[%s1898_s3 + $0xec] ss:$16 sps:$4 sm:$0xff]   ;;  %v1414_v4 = vld [vmem:[%s1898_s3 + $0xe8] ss:$16 sps:$4 sm:$0xff]  }
  0x2b   : > { %v1237_v5 = vld [vmem:[%s1900_s5 + $0x8] sm:$0xff]  ;;  %v1419_v7 = vld [vmem:[%s1897_s2 + $0x4] ss:$16 sps:$4 sm:$0xff]   ;;  %v1417_v8 = vld [vmem:[%s1897_s2] ss:$16 sps:$4 sm:$0xff]  }
  0x2c   : > { %453 = vmatpush1.bf16.msra.mxu0 %v1346_v22  ;;  %494 = vmatpush1.bf16.msra.mxu1 %v1362_v28  ;;  %v588_v6 = vpack.c.bf16 %v1237_v5, %v1237_v5  ;;  %v1420_v9 = vld [vmem:[%s1897_s2 + $0x8] ss:$16 sps:$4 sm:$0xff]   ;;  %v1422_v10 = vld [vmem:[%s1897_s2 + $0xc] ss:$16 sps:$4 sm:$0xff]   ;;  %v1425_v11 = vld [vmem:[%s1897_s2 + $0x24] ss:$16 sps:$4 sm:$0xff]  }
  0x2d   : > { %454 = vmatprep.subr.bf16.mxu0 %v1348_v23  ;;  %495 = vmatprep.subr.bf16.mxu1 %v1363_v29  ;;  %v1428_v12 = vld [vmem:[%s1897_s2 + $0x2c] ss:$16 sps:$4 sm:$0xff]   ;;  %v1423_v13 = vld [vmem:[%s1897_s2 + $0x20] ss:$16 sps:$4 sm:$0xff]   ;;  %v1426_v14 = vld [vmem:[%s1897_s2 + $0x28] ss:$16 sps:$4 sm:$0xff]  }
  0x2e   : > { %v1431_v15 = vld [vmem:[%s1897_s2 + $0x44] ss:$16 sps:$4 sm:$0xff]   ;;  %v1429_v16 = vld [vmem:[%s1897_s2 + $0x40] ss:$16 sps:$4 sm:$0xff]   ;;  %v1432_v17 = vld [vmem:[%s1897_s2 + $0x48] ss:$16 sps:$4 sm:$0xff]  }
  0x2f   : > { %v1437_v18 = vld [vmem:[%s1897_s2 + $0x64] ss:$16 sps:$4 sm:$0xff]   ;;  %v1440_v19 = vld [vmem:[%s1897_s2 + $0x6c] ss:$16 sps:$4 sm:$0xff]   ;;  %v1435_v20 = vld [vmem:[%s1897_s2 + $0x60] ss:$16 sps:$4 sm:$0xff]  }
  0x30   : > { %455 = vmatpush1.bf16.msra.mxu0 %v1352_v26  ;;  %496 = vmatpush1.bf16.msra.mxu1 %v1365_v32  ;;  %v1438_v21 = vld [vmem:[%s1897_s2 + $0x68] ss:$16 sps:$4 sm:$0xff]   ;;  %v1443_v22 = vld [vmem:[%s1897_s2 + $0x84] ss:$16 sps:$4 sm:$0xff]   ;;  %v1446_v23 = vld [vmem:[%s1897_s2 + $0x8c] ss:$16 sps:$4 sm:$0xff]  }
  0x31   : > { %456 = vmatprep.subr.bf16.mxu0 %v1354_v27  ;;  %497 = vmatprep.subr.bf16.mxu1 %v1366_v34  ;;  %v1441_v24 = vld [vmem:[%s1897_s2 + $0x80] ss:$16 sps:$4 sm:$0xff]   ;;  %v1444_v25 = vld [vmem:[%s1897_s2 + $0x88] ss:$16 sps:$4 sm:$0xff]   ;;  %v1449_v27 = vld [vmem:[%s1897_s2 + $0xa4] ss:$16 sps:$4 sm:$0xff]  }
  0x32   : > { %v1447_v26 = vld [vmem:[%s1897_s2 + $0xa0] ss:$16 sps:$4 sm:$0xff]   ;;  %v1450_v28 = vld [vmem:[%s1897_s2 + $0xa8] ss:$16 sps:$4 sm:$0xff]   ;;  %v1452_v29 = vld [vmem:[%s1897_s2 + $0xac] ss:$16 sps:$4 sm:$0xff]  }
  0x33   : > { %v1458_v31 = vld [vmem:[%s1897_s2 + $0xcc] ss:$16 sps:$4 sm:$0xff]   ;;  %v1453_v32 = vld [vmem:[%s1897_s2 + $0xc0] ss:$16 sps:$4 sm:$0xff]   ;;  %v1461_v34 = vld [vmem:[%s1897_s2 + $0xe4] ss:$16 sps:$4 sm:$0xff]  }
  0x34   : > { %457 = vmatpush1.bf16.msra.mxu0 %v1358_v30  ;;  %498 = vmatpush1.bf16.msra.mxu1 %v1368_v36  ;;  %v1455_v30 = vld [vmem:[%s1897_s2 + $0xc4] ss:$16 sps:$4 sm:$0xff]   ;;  %v1459_v36 = vld [vmem:[%s1897_s2 + $0xe0] ss:$16 sps:$4 sm:$0xff]  }
  0x35   : > { %781 = vmatprep.subr.bf16.mxu0 %v1371_v33  ;;  %822 = vmatprep.subr.bf16.mxu1 %v1374_v39  ;;  %v1456_v33 = vld [vmem:[%s1897_s2 + $0xc8] ss:$16 sps:$4 sm:$0xff]  }
  0x36   : > { %v245_v39 = vld [vmem:[%s1553_s27 + $0x8] sm:$0xff] }
  0x37   : > { %475 = vmatmul.mubr.bf16.vlgmr.msra.gmra.mrb[0].mxu0 %v249_v35  ;;  %516 = vmatmul.mubr.bf16.vlgmr.msra.gmra.mrb[0].mxu1 %v249_v35  ;;  %v1464_v35 = vld [vmem:[%s1897_s2 + $0xec] ss:$16 sps:$4 sm:$0xff]  }
  0x38   : > { %782 = vmatpush1.bf16.msra.mxu0 %v1369_v37  ;;  %813 = vmatprep.mubr.bf16.mxu0 %v1506_v3  ;;  %v1462_v37 = vld [vmem:[%s1897_s2 + $0xe8] ss:$16 sps:$4 sm:$0xff]  }
  0x39   : > { %783 = vmatprep.subr.bf16.mxu0 %v1377_v38  ;;  %823 = vmatpush1.bf16.msra.mxu1 %v1372_v41  ;;  %v244_v38 = vld [vmem:[%s1553_s27] sm:$0xff] }
  0x3a   : > { %824 = vmatprep.subr.bf16.mxu1 %v1380_v43  ;;  %854 = vmatprep.mubr.bf16.mxu1 %v1506_v3 }
  0x3c   : > { %784 = vmatpush1.bf16.msra.mxu0 %v1375_v40 }
  0x3d   : > { %785 = vmatprep.subr.bf16.mxu0 %v1383_v42  ;;  %825 = vmatpush1.bf16.msra.mxu1 %v1378_v45 }
  0x3e   : > { %826 = vmatprep.subr.bf16.mxu1 %v1386_v47 }
  0x40   : > { %786 = vmatpush1.bf16.msra.mxu0 %v1381_v44 }
  0x41   : > { %787 = vmatprep.subr.bf16.mxu0 %v1389_v46  ;;  %827 = vmatpush1.bf16.msra.mxu1 %v1384_v49 }
  0x42   : > { %828 = vmatprep.subr.bf16.mxu1 %v1392_v51 }
  0x44   : > { %788 = vmatpush1.bf16.msra.mxu0 %v1387_v48  ;;  %v247_v48 = vld [vmem:[%s1553_s27 + $0x18] sm:$0xff] }
  0x45   : > { %789 = vmatprep.subr.bf16.mxu0 %v1395_v50  ;;  %829 = vmatpush1.bf16.msra.mxu1 %v1390_v53 }
  0x46   : > { %830 = vmatprep.subr.bf16.mxu1 %v1398_v54  ;;  %v246_v54 = vld [vmem:[%s1553_s27 + $0x10] sm:$0xff] }
  0x48   : > { %790 = vmatpush1.bf16.msra.mxu0 %v1393_v52 }
  0x49   : > { %831 = vmatpush1.bf16.msra.mxu1 %v1396_v55  ;;  %791 = vmatprep.subr.bf16.mxu0 %v1401_v56 }
  0x4a   : > { %832 = vmatprep.subr.bf16.mxu1 %v1404_v58 }
  0x4c   : > { %792 = vmatpush1.bf16.msra.mxu0 %v1399_v57 }
  0x4d   : > { %833 = vmatpush1.bf16.msra.mxu1 %v1402_v59  ;;  %793 = vmatprep.subr.bf16.mxu0 %v1407_v60 }
  0x4e   : > { %834 = vmatprep.subr.bf16.mxu1 %v1410_v62 }
  0x50   : > { %794 = vmatpush1.bf16.msra.mxu0 %v1405_v61 }
  0x51   : > { %835 = vmatpush1.bf16.msra.mxu1 %v1408_v63  ;;  %795 = vmatprep.subr.bf16.mxu0 %v1413_v0  ;;  %v528_v63 = vld [vmem:[%s1901_s6] sm:$0xff] }
  0x52   : > { %836 = vmatprep.subr.bf16.mxu1 %v1416_v2 }
  0x54   : > { %796 = vmatpush1.bf16.msra.mxu0 %v1411_v1 }
  0x55   : > { %837 = vmatpush1.bf16.msra.mxu1 %v1414_v4  ;;  %1023 = vmatprep.subr.bf16.mxu0 %v1419_v7 }
  0x56   : > { %1064 = vmatprep.subr.bf16.mxu1 %v1422_v10 }
  0x57   : > { %814 = vmatmul.mubr.bf16.vlgmr.msra.gmra.mrb[4].mxu0 %v588_v6 }
  0x58   : > { %1055 = vmatprep.mubr.bf16.mxu0 %v1506_v3  ;;  %855 = vmatmul.mubr.bf16.vlgmr.msra.gmra.mrb[4].mxu1 %v588_v6 }
  0x59   : > { %1024 = vmatpush1.bf16.msra.mxu0 %v1417_v8  ;;  %1065 = vmatpush1.bf16.msra.mxu1 %v1420_v9 }
  0x5a   : > { %1096 = vmatprep.mubr.bf16.mxu1 %v1506_v3  ;;  %1025 = vmatprep.subr.bf16.mxu0 %v1425_v11  ;;  %v1434_v3 = vld [vmem:[%s1897_s2 + $0x4c] ss:$16 sps:$4 sm:$0xff]  }
  0x5b   : > { %1066 = vmatprep.subr.bf16.mxu1 %v1428_v12 }
  0x5d   : > { %1026 = vmatpush1.bf16.msra.mxu0 %v1423_v13  ;;  %1067 = vmatpush1.bf16.msra.mxu1 %v1426_v14 }
  0x5e   : > { %1027 = vmatprep.subr.bf16.mxu0 %v1431_v15  ;;  %1068 = vmatprep.subr.bf16.mxu1 %v1434_v3 }
  0x61   : > { %1028 = vmatpush1.bf16.msra.mxu0 %v1429_v16  ;;  %1069 = vmatpush1.bf16.msra.mxu1 %v1432_v17 }
  0x62   : > { %1029 = vmatprep.subr.bf16.mxu0 %v1437_v18  ;;  %1070 = vmatprep.subr.bf16.mxu1 %v1440_v19  ;;  %v1107_v18 = vlaneseq }
  0x64   : > { %v1108_v19 = vshrl.u32 %v1107_v18, 7 }
  0x65   : > { %1030 = vmatpush1.bf16.msra.mxu0 %v1435_v20  ;;  %1071 = vmatpush1.bf16.msra.mxu1 %v1438_v21  ;;  %v1105_v21 = vld [vmem:[%s1899_s4] sm:$0xf] }
  0x66   : > { %1031 = vmatprep.subr.bf16.mxu0 %v1443_v22  ;;  %1072 = vmatprep.subr.bf16.mxu1 %v1446_v23  ;;  %v1109_v20 = vsub.s32 0, %v1108_v19  ;;  %v1113_v22 = vsub.s32 1, %v1108_v19 }
  0x68   : > { %v1110_v23 = vrot.slane %v1105_v21, %v1109_v20 }
  0x69   : > { %1032 = vmatpush1.bf16.msra.mxu0 %v1441_v24  ;;  %1073 = vmatpush1.bf16.msra.mxu1 %v1444_v25 }
  0x6a   : > { %1033 = vmatprep.subr.bf16.mxu0 %v1449_v27  ;;  %1074 = vmatprep.subr.bf16.mxu1 %v1452_v29 }
  0x6d   : > { %1034 = vmatpush1.bf16.msra.mxu0 %v1447_v26  ;;  %1075 = vmatpush1.bf16.msra.mxu1 %v1450_v28  ;;  %v1114_v26 = vrot.slane %v1105_v21, %v1113_v22 }
  0x6e   : > { %1035 = vmatprep.subr.bf16.mxu0 %v1455_v30  ;;  %1076 = vmatprep.subr.bf16.mxu1 %v1458_v31 }
  0x71   : > { %1036 = vmatpush1.bf16.msra.mxu0 %v1453_v32  ;;  %1077 = vmatpush1.bf16.msra.mxu1 %v1456_v33  ;;  %v1121_v33 = vsub.s32 3, %v1108_v19 }
  0x72   : > { %1037 = vmatprep.subr.bf16.mxu0 %v1461_v34  ;;  %1078 = vmatprep.subr.bf16.mxu1 %v1464_v35 }
  0x75   : > { %1038 = vmatpush1.bf16.msra.mxu0 %v1459_v36  ;;  %1079 = vmatpush1.bf16.msra.mxu1 %v1462_v37 }
 0x10a   : > { %v476_v40 = vpop.f32.mrb[0].mxu0  ;;  %v517_v49 = vpop.f32.mrb[0].mxu1 }
 0x10b   : > { %v524_v41 = vadd.f32 %v476_v40, %v244_v38  ;;  %v478_v42 = vpop.f32.mrb[1].mxu0  ;;  %v519_v50 = vpop.f32.mrb[1].mxu1  ;;  %v526_v56 = vadd.f32 %v517_v49, %v246_v54  ;;  %v1302_v54 = vld [vmem:[%s1901_s6 + $0x8] sm:$0xff] }
 0x10c   : > { %v525_v43 = vadd.f32 %v478_v42, %v245_v39  ;;  %v480_v44 = vpop.f32.mrb[2].mxu0  ;;  %v527_v51 = vadd.f32 %v519_v50, %v247_v48  ;;  %v521_v52 = vpop.f32.mrb[2].mxu1  ;;  %v1122_v42 = vrot.slane %v1105_v21, %v1121_v33 }
 0x10d   : > { %v1234_v45 = vmul.f32 -1.442695, %v524_v41  ;;  %v481_v46 = vpop.f32.mrb[3].mxu0  ;;  %v522_v53 = vpop.f32.mrb[3].mxu1 }
 0x10e   : > { %v1235_v47 = vmul.f32 -1.442695, %v525_v43  ;;  %v1236_v55 = vmul.f32 -1.442695, %v527_v51  ;;  %v1117_v43 = vsub.s32 2, %v1108_v19 }
 0x10f   : > { %1465 = vpow2.f32 %v1234_v45 }
 0x110   : > { %1467 = vpow2.f32 %v1235_v47  ;;  %v1118_v45 = vrot.slane %v1105_v21, %v1117_v43 }
 0x111   : > { %1469 = vpow2.f32 %v1236_v55 }
 0x112   : > { %1471 = vtanh.f32 %v526_v56 }
 0x119   : > { %v1466_v57 = vpop.eup %1465 }
 0x11a   : > { %v1468_v58 = vpop.eup %1467  ;;  %v532_v59 = vadd.f32 1.0, %v1466_v57 }
 0x11b   : > { %v538_v60 = vadd.f32 1.0, %v1468_v58  ;;  %v1470_v61 = vpop.eup %1469 }
 0x11c   : > { %1473 = vrcp.f32 %v532_v59  ;;  %v1472_v62 = vpop.eup %1471  ;;  %v545_v1 = vadd.f32 1.0, %v1470_v61 }
 0x11d   : > { %1475 = vrcp.f32 %v538_v60 }
 0x11e   : > { %1477 = vrcp.f32 %v545_v1 }
 0x126   : > { %v1474_v0 = vpop.eup %1473 }
 0x127   : > { %v1476_v2 = vpop.eup %1475  ;;  %v549_v4 = vmul.f32 %v1474_v0, %v1472_v62 }
 0x128   : > { %v548_v5 = vmul.f32 %v1476_v2, %v528_v63  ;;  %v1478_v7 = vpop.eup %1477 }
 0x12a   : > { %v550_v6 = vadd.f32 %v549_v4, %v548_v5  ;;  %v815_v11 = vpop.f32.mrb[4].mxu0 }
 0x12b   : > { %v817_v12 = vpop.f32.mrb[5].mxu0  ;;  %v856_v14 = vpop.f32.mrb[4].mxu1 }
 0x12c   : > { %1479 = vtanh.f32 %v550_v6  ;;  %1159 = vst [vmem:[%s1901_s6] sm:$0xff] %v550_v6  ;;  %v819_v13 = vpop.f32.mrb[6].mxu0  ;;  %v858_v3 = vpop.f32.mrb[5].mxu1 }
 0x12d   : > { %v820_v15 = vpop.f32.mrb[7].mxu0  ;;  %v860_v16 = vpop.f32.mrb[6].mxu1 }
 0x12e   : > { %v861_v17 = vpop.f32.mrb[7].mxu1 }
 0x136   : > { %v1480_v8 = vpop.eup %1479 }
 0x137   : > { %v552_v9 = vmul.f32 %v1480_v8, %v1478_v7 }
 0x139   : > { %v553_v10 = vpack.c.bf16 %v552_v9, %v552_v9  ;;  %1157 = vst [vmem:[%s1900_s5] sm:$0xff] %v552_v9 }
 0x13b   : > { %1056 = vmatmul.mubr.bf16.vlgmr.msra.gmra.mrb[8].mxu0 %v553_v10  ;;  %1097 = vmatmul.mubr.bf16.vlgmr.msra.gmra.mrb[8].mxu1 %v553_v10 }
 0x20e   : > { %v1057_v24 = vpop.f32.mrb[8].mxu0  ;;  %v1098_v25 = vpop.f32.mrb[8].mxu1 }
 0x20f   : > { %v1058_v27 = vadd.f32 %v1057_v24, %v815_v11  ;;  %v1099_v28 = vadd.f32 %v1098_v25, %v856_v14  ;;  %v1059_v29 = vpop.f32.mrb[9].mxu0  ;;  %v1100_v30 = vpop.f32.mrb[9].mxu1 }
 0x210   : > { %v1060_v31 = vadd.f32 %v1059_v29, %v817_v12  ;;  %v1101_v32 = vadd.f32 %v1100_v30, %v858_v3  ;;  %v1061_v34 = vpop.f32.mrb[10].mxu0  ;;  %v1102_v35 = vpop.f32.mrb[10].mxu1 }
 0x211   : > { %v1127_v36 = vadd.f32 %v1110_v23, %v1058_v27  ;;  %v1062_v37 = vpop.f32.mrb[11].mxu0  ;;  %v1103_v38 = vpop.f32.mrb[11].mxu1  ;;  %v1129_v47 = vadd.f32 %v1118_v45, %v1099_v28 }
 0x212   : > { %v1128_v39 = vadd.f32 %v1114_v26, %v1060_v31  ;;  %v1130_v44 = vadd.f32 %v1122_v42, %v1101_v32 }
 0x213   : > { %v1303_v40 = vmul.f32 -1.442695, %v1127_v36 }
 0x214   : > { %v1304_v41 = vmul.f32 -1.442695, %v1128_v39  ;;  %v1305_v46 = vmul.f32 -1.442695, %v1130_v44 }
 0x215   : > { %1481 = vpow2.f32 %v1303_v40 }
 0x216   : > { %1483 = vpow2.f32 %v1304_v41 }
 0x217   : > { %1485 = vpow2.f32 %v1305_v46 }
 0x218   : > { %1487 = vtanh.f32 %v1129_v47 }
 0x21f   : > { %v1482_v48 = vpop.eup %1481 }
 0x220   : > { %v1484_v49 = vpop.eup %1483  ;;  %v1136_v50 = vadd.f32 1.0, %v1482_v48 }
 0x221   : > { %v1142_v51 = vadd.f32 1.0, %v1484_v49  ;;  %v1486_v52 = vpop.eup %1485 }
 0x222   : > { %1489 = vrcp.f32 %v1136_v50  ;;  %v1488_v53 = vpop.eup %1487  ;;  %v1149_v58 = vadd.f32 1.0, %v1486_v52 }
 0x223   : > { %1491 = vrcp.f32 %v1142_v51 }
 0x224   : > { %1493 = vrcp.f32 %v1149_v58 }
 0x22c   : > { %v1490_v55 = vpop.eup %1489 }
 0x22d   : > { %v1492_v56 = vpop.eup %1491  ;;  %v1153_v57 = vmul.f32 %v1490_v55, %v1488_v53 }
 0x22e   : > { %v1152_v59 = vmul.f32 %v1492_v56, %v1302_v54  ;;  %v1494_v61 = vpop.eup %1493 }
 0x230   : > { %v1154_v60 = vadd.f32 %v1153_v57, %v1152_v59 }
 0x232   : > { %1495 = vtanh.f32 %v1154_v60  ;;  %1307 = vst [vmem:[%s1901_s6 + $0x8] sm:$0xff] %v1154_v60 }
 0x23c   : > { %v1496_v62 = vpop.eup %1495 }
 0x23d   : > { %v1156_v63 = vmul.f32 %v1496_v62, %v1494_v61 }
 0x23f   : > { %1306 = vst [vmem:[%s1900_s5 + $0x8] sm:$0xff] %v1156_v63 }
 0x240 PF: > { %s17_s21 = sadd.s32 1, %s1503_s21  }
 0x241   : > { %p14_p5 = scmp.ge.s32.totalorder %s17_s21, 10  }
 0x243   :  { %16 = sbr.rel (!%p14_p5) target bundleno = 1 (0x1), region = 80 }

// kernel: seq2seq_forward.5
= control target key start
LH: loop header
LB: loop body
LE: loop exit
PB: predicated region body
PF: predicated region fallthrough
CT: control target
= control target key end

     0   :  { %18 = vsyncpa [#allocation6], 0  ;;  %s2552_s25 = smov 0   ;;  %s3120_s0 = inlined_call_operand.vmem [shape: s32[7], index: 0, kind: input, shape index: {}]   ;;  %s3121_s1 = inlined_call_operand.vmem [shape: bf16[128,128], index: 1, kind: input, shape index: {}]   ;;  %s3122_s2 = inlined_call_operand.vmem [shape: bf16[128,512], index: 2, kind: input, shape index: {}]   ;;  %s3123_s3 = inlined_call_operand.vmem [shape: bf16[128,512], index: 3, kind: input, shape index: {}]   ;;  %s3124_s4 = inlined_call_operand.vmem [shape: f32[1,512], index: 4, kind: input, shape index: {}]   ;;  %s3125_s5 = inlined_call_operand.vmem [shape: bf16[128,512], index: 5, kind: input, shape index: {}]   ;;  %s3126_s6 = inlined_call_operand.vmem [shape: bf16[128,512], index: 6, kind: input, shape index: {}]   ;;  %s3127_s7 = inlined_call_operand.vmem [shape: f32[1,512], index: 7, kind: input, shape index: {}]   ;;  %s3128_s8 = inlined_call_operand.vmem [shape: bf16[128,128], index: 8, kind: input, shape index: {}]   ;;  %s3129_s9 = inlined_call_operand.vmem [shape: f32[1,128], index: 9, kind: input, shape index: {}]   ;;  %s3130_s10 = inlined_call_operand.vmem [shape: bf16[8,8,128], index: 10, kind: input, shape index: {}]   ;;  %s3131_s11 = inlined_call_operand.vmem [shape: f32[2,8,128], index: 11, kind: input, shape index: {}]   ;;  %s3132_s12 = inlined_call_operand.vmem [shape: f32[2,8,128], index: 12, kind: input, shape index: {}]   ;;  %s3133_s13 = inlined_call_operand.vmem [shape: f32[7,8,128], index: 13, kind: output, shape index: {}]  }
   0x1 LB: > { %s2558_s26 = sadd.s32 4294967295, %s2476_s25   ;;  %p1969_p0 = scmp.ge.s32.totalorder %s2476_s25, 1  ;;  %s2476_s25 = sphi %s2552_s25, %s24_s25  }
   0x2   : > { %p328_p1 = scmp.lt.s32.totalorder %s2476_s25, 8  ;;  %s341_s29 = sshll.u32 %s3120_s0, 4  ;;  %s342_s29 = int_to_ptr.vmem [resolvable:$true] %s341_s29 }
   0x3   : > { %p2197_p4 = scmp.eq.s32.totalorder %s2558_s26, 0  ;;  %s2451_s14 = scalar_lea.vmem %s342_s29, 16 }
   0x4   : > { %p2566_p3 = pnand %p1969_p0, %p328_p1  ;;  %p2452_p7 = scmp.ne.s32.totalorder %s342_s29, %s2451_s14 }
   0x5   : > { %p2459_p11 = scmp.lt.s32.totalorder %s342_s29, %s342_s29  ;;  %p2460_p12 = scmp.lt.s32.totalorder %s2451_s14, %s2451_s14 }
   0x6   : > { %p2193_p5 = pneg %p2566_p3 }
   0x7   : > { %p2461_p13 = por %p2460_p12, %p2459_p11 }
   0x8   : > { %p2194_p6 = pnand %p2197_p4, %p2193_p5 }
   0xa   : > { %p2453_p8 = pneg %p2194_p6 }
   0xc   : > { %p2454_p9 = pnand %p2453_p8, %p2452_p7 }
   0xe   : > { %p2455_p10 = pneg %p2454_p9 }
  0x10   : > { %p2462_p2 = pnand %p2461_p13, %p2455_p10 }
  0x12   : > { %2465 = shalt.err (!%p2462_p2)
}
  0x13   : > { %s2478_s15 = smov [#allocation5]   ;;  %390 = sbr.rel (%p2566_p3) target bundleno = 1468 (0x5bc), region = 72 }
  0x14   : > { %2196 = dma.vmem_to_smem (!%p2194_p6), %s342_s29, 16, %s2478_s15, [#allocation6]  }
  0x1a   : > { %2471 = dma.done.wait (%p2197_p4), [#allocation6], 16  }
  0x1b   : > { %2473 = vsyncadd (%p2197_p4), [#allocation6], 4294967280 }
  0x1c   : > { %396 = sfence }
  0x1d   : > { %p429_p0 = scmp.lt.s32.totalorder %s2558_s26, 6  ;;  %p3135_p1 = scmp.ne.s32.totalorder %s2558_s26, 0 }
  0x1e   : > { %v438_v0 = vld [vmem:[%s3131_s11] sm:$0xff] (!%p3135_p1)  ;;  %v439_v1 = vld [vmem:[%s3131_s11 + $0x8] sm:$0xff] (!%p3135_p1) }
  0x1f   : > { %s430_s16 = scalar_select %p429_p0, %s2558_s26, 6 }
  0x20   : > { %437 = sbr.rel (%p3135_p1) target bundleno = 39 (0x27), region = 80  ;;  %v442_v2 = vld [vmem:[%s3132_s12] sm:$0xff] (!%p3135_p1)  ;;  %440 = vst [vmem:[#allocation2] sm:$0xff] (!%p3135_p1), %v438_v0  ;;  %441 = vst [vmem:[#allocation2 + $0x8] sm:$0xff] (!%p3135_p1), %v439_v1  ;;  %v443_v3 = vld [vmem:[%s3132_s12 + $0x8] sm:$0xff] (!%p3135_p1) }
  0x21   : > { %s1973_s17 = sshll.u32 %s430_s16, 3  ;;  %444 = vst [vmem:[#allocation3] sm:$0xff] (!%p3135_p1), %v442_v2  ;;  %v446_v4 = vld [vmem:[%s3130_s10] sm:$0xf] (!%p3135_p1)  ;;  %445 = vst [vmem:[#allocation3 + $0x8] sm:$0xff] (!%p3135_p1), %v443_v3 }
  0x22   : > { %s2586_s20 = scalar_lea.vmem %s3133_s13, %s1973_s17  ;;  %447 = vst [vmem:[#allocation4] sm:$0xf] (!%p3135_p1), %v446_v4 }
  0x27 PF: > { %v2211_v5 = vld [vmem:[%s3121_s1] sm:$0xff]   ;;  %v2479_v6 = vmov 0.0   ;;  %v2212_v7 = vld [vmem:[%s3121_s1 + $0x8] sm:$0xff]   ;;  %vm2480_vm0 = vmmov 0   ;;  %v2481_v8 = vmov 0   ;;  %v2213_v9 = vld [vmem:[%s3121_s1 + $0x10] sm:$0xff]  }
  0x28   : > { %2149 = vmatprep.subr.bf16.mxu0 %v2479_v6  ;;  %2165 = vmatprep.mubr.msk.bf16.mxu0 %vm2480_vm0, %v2479_v6  ;;  %v2219_v10 = vld [vmem:[%s3123_s3 + $0x4] ss:$16 sps:$4 sm:$0xff]   ;;  %v2221_v11 = vld [vmem:[%s3123_s3] ss:$16 sps:$4 sm:$0xff]   ;;  %v2214_v12 = vld [vmem:[%s3121_s1 + $0x18] sm:$0xff]   ;;  %s1900_s16 = sld [smem:[#allocation5 + %s2558_s26]] }
  0x29   : > { %2150 = vmatpush3.bf16.msra.mxu0 %v2211_v5  ;;  %812 = vmatprep.mubr.bf16.mxu1 %v2481_v8  ;;  %v2225_v13 = vld [vmem:[%s3123_s3 + $0x24] ss:$16 sps:$4 sm:$0xff]   ;;  %v2227_v14 = vld [vmem:[%s3123_s3 + $0x20] ss:$16 sps:$4 sm:$0xff]   ;;  %v2216_v19 = vld [vmem:[%s3121_s1 + $0x28] sm:$0xff]   ;;  %s2127_s17 = sshll.u32 %s2558_s26, 2 }
  0x2a   : > { %2151 = vmatprep.subr.bf16.mxu0 %v2479_v6  ;;  %780 = vmatprep.subr.bf16.mxu1 %v2219_v10  ;;  %v2215_v15 = vld [vmem:[%s3121_s1 + $0x20] sm:$0xff]   ;;  %v2217_v22 = vld [vmem:[%s3121_s1 + $0x30] sm:$0xff]   ;;  %v2218_v25 = vld [vmem:[%s3121_s1 + $0x38] sm:$0xff]   ;;  %s1938_s21 = scalar_lea.vmem %s3130_s10, %s2127_s17 }
  0x2b   : > { %781 = vmatpush1.bf16.msra.mxu1 %v2221_v11  ;;  %v2231_v16 = vld [vmem:[%s3123_s3 + $0x44] ss:$16 sps:$4 sm:$0xff]   ;;  %v2233_v17 = vld [vmem:[%s3123_s3 + $0x40] ss:$16 sps:$4 sm:$0xff]   ;;  %v2224_v26 = vld [vmem:[%s3123_s3 + $0xc] ss:$16 sps:$4 sm:$0xff]  }
  0x2c   : > { %782 = vmatprep.subr.bf16.mxu1 %v2225_v13  ;;  %v2237_v18 = vld [vmem:[%s3123_s3 + $0x64] ss:$16 sps:$4 sm:$0xff]   ;;  %v2239_v20 = vld [vmem:[%s3123_s3 + $0x60] ss:$16 sps:$4 sm:$0xff]   ;;  %v2222_v30 = vld [vmem:[%s3123_s3 + $0x8] ss:$16 sps:$4 sm:$0xff]  }
  0x2d   : > { %2152 = vmatpush3.bf16.msra.mxu0 %v2212_v7  ;;  %v2243_v21 = vld [vmem:[%s3123_s3 + $0x84] ss:$16 sps:$4 sm:$0xff]   ;;  %v2245_v23 = vld [vmem:[%s3123_s3 + $0x80] ss:$16 sps:$4 sm:$0xff]   ;;  %v2230_v31 = vld [vmem:[%s3123_s3 + $0x2c] ss:$16 sps:$4 sm:$0xff]  }
  0x2e   : > { %2153 = vmatprep.subr.bf16.mxu0 %v2479_v6  ;;  %v2249_v24 = vld [vmem:[%s3123_s3 + $0xa4] ss:$16 sps:$4 sm:$0xff]   ;;  %v2251_v27 = vld [vmem:[%s3123_s3 + $0xa0] ss:$16 sps:$4 sm:$0xff]   ;;  %v2228_v34 = vld [vmem:[%s3123_s3 + $0x28] ss:$16 sps:$4 sm:$0xff]  }
  0x2f   : > { %783 = vmatpush1.bf16.msra.mxu1 %v2227_v14  ;;  %v448_v28 = vld [vmem:[#allocation4] sm:$0xf]  ;;  %v2255_v29 = vld [vmem:[%s3123_s3 + $0xc4] ss:$16 sps:$4 sm:$0xff]   ;;  %v2236_v35 = vld [vmem:[%s3123_s3 + $0x4c] ss:$16 sps:$4 sm:$0xff]  }
  0x30   : > { %784 = vmatprep.subr.bf16.mxu1 %v2231_v16  ;;  %v2257_v32 = vld [vmem:[%s3123_s3 + $0xc0] ss:$16 sps:$4 sm:$0xff]   ;;  %v2261_v33 = vld [vmem:[%s3123_s3 + $0xe4] ss:$16 sps:$4 sm:$0xff]   ;;  %v2234_v39 = vld [vmem:[%s3123_s3 + $0x48] ss:$16 sps:$4 sm:$0xff]  }
  0x31   : > { %2154 = vmatpush3.bf16.msra.mxu0 %v2213_v9  ;;  %v2263_v36 = vld [vmem:[%s3123_s3 + $0xe0] ss:$16 sps:$4 sm:$0xff]   ;;  %v2269_v38 = vld [vmem:[%s3122_s2 + $0x4] ss:$16 sps:$4 sm:$0xff]   ;;  %v2242_v40 = vld [vmem:[%s3123_s3 + $0x6c] ss:$16 sps:$4 sm:$0xff]  }
  0x32   : > { %2155 = vmatprep.subr.bf16.mxu0 %v2479_v6  ;;  %v586_v37 = vld [vmem:[#allocation2] sm:$0xff]  ;;  %v2240_v44 = vld [vmem:[%s3123_s3 + $0x68] ss:$16 sps:$4 sm:$0xff]   ;;  %v2248_v45 = vld [vmem:[%s3123_s3 + $0x8c] ss:$16 sps:$4 sm:$0xff]   ;;  %p1901_p2 = scmp.gt.s32.totalorder %s1900_s16, 0 }
  0x33   : > { %785 = vmatpush1.bf16.msra.mxu1 %v2233_v17  ;;  %v587_v41 = vpack.c.bf16 %v586_v37, %v586_v37  ;;  %v2267_v42 = vld [vmem:[%s3122_s2] ss:$16 sps:$4 sm:$0xff]   ;;  %v2275_v43 = vld [vmem:[%s3122_s2 + $0x24] ss:$16 sps:$4 sm:$0xff]   ;;  %v2246_v48 = vld [vmem:[%s3123_s3 + $0x88] ss:$16 sps:$4 sm:$0xff]  }
  0x34   : > { %786 = vmatprep.subr.bf16.mxu1 %v2237_v18  ;;  %v2273_v46 = vld [vmem:[%s3122_s2 + $0x20] ss:$16 sps:$4 sm:$0xff]   ;;  %v2281_v47 = vld [vmem:[%s3122_s2 + $0x44] ss:$16 sps:$4 sm:$0xff]   ;;  %v2254_v49 = vld [vmem:[%s3123_s3 + $0xac] ss:$16 sps:$4 sm:$0xff]  }
  0x35   : > { %2156 = vmatpush3.bf16.msra.mxu0 %v2214_v12  ;;  %v2252_v50 = vld [vmem:[%s3123_s3 + $0xa8] ss:$16 sps:$4 sm:$0xff]   ;;  %v2279_v51 = vld [vmem:[%s3122_s2 + $0x40] ss:$16 sps:$4 sm:$0xff]   ;;  %v2260_v52 = vld [vmem:[%s3123_s3 + $0xcc] ss:$16 sps:$4 sm:$0xff]  }
  0x36   : > { %2157 = vmatprep.subr.bf16.mxu0 %v2479_v6  ;;  %v2287_v53 = vld [vmem:[%s3122_s2 + $0x64] ss:$16 sps:$4 sm:$0xff]   ;;  %v2285_v54 = vld [vmem:[%s3122_s2 + $0x60] ss:$16 sps:$4 sm:$0xff]   ;;  %v2258_v56 = vld [vmem:[%s3123_s3 + $0xc8] ss:$16 sps:$4 sm:$0xff]  }
  0x37   : > { %787 = vmatpush1.bf16.msra.mxu1 %v2239_v20  ;;  %v2293_v55 = vld [vmem:[%s3122_s2 + $0x84] ss:$16 sps:$4 sm:$0xff]   ;;  %v2266_v57 = vld [vmem:[%s3123_s3 + $0xec] ss:$16 sps:$4 sm:$0xff]   ;;  %v2291_v58 = vld [vmem:[%s3122_s2 + $0x80] ss:$16 sps:$4 sm:$0xff]  }
  0x38   : > { %788 = vmatprep.subr.bf16.mxu1 %v2243_v21  ;;  %v2299_v59 = vld [vmem:[%s3122_s2 + $0xa4] ss:$16 sps:$4 sm:$0xff]   ;;  %v2264_v60 = vld [vmem:[%s3123_s3 + $0xe8] ss:$16 sps:$4 sm:$0xff]   ;;  %v2272_v61 = vld [vmem:[%s3122_s2 + $0xc] ss:$16 sps:$4 sm:$0xff]  }
  0x39   : > { %2158 = vmatpush3.bf16.msra.mxu0 %v2215_v15  ;;  %v2297_v62 = vld [vmem:[%s3122_s2 + $0xa0] ss:$16 sps:$4 sm:$0xff]   ;;  %v2305_v63 = vld [vmem:[%s3122_s2 + $0xc4] ss:$16 sps:$4 sm:$0xff]   ;;  %v2270_v0 = vld [vmem:[%s3122_s2 + $0x8] ss:$16 sps:$4 sm:$0xff]  }
  0x3a   : > { %2159 = vmatprep.subr.bf16.mxu0 %v2479_v6  ;;  %v2278_v1 = vld [vmem:[%s3122_s2 + $0x2c] ss:$16 sps:$4 sm:$0xff]   ;;  %v2303_v2 = vld [vmem:[%s3122_s2 + $0xc0] ss:$16 sps:$4 sm:$0xff]   ;;  %v2311_v3 = vld [vmem:[%s3122_s2 + $0xe4] ss:$16 sps:$4 sm:$0xff]  }
  0x3b   : > { %789 = vmatpush1.bf16.msra.mxu1 %v2245_v23  ;;  %v2276_v4 = vld [vmem:[%s3122_s2 + $0x28] ss:$16 sps:$4 sm:$0xff]   ;;  %v2284_v5 = vld [vmem:[%s3122_s2 + $0x4c] ss:$16 sps:$4 sm:$0xff]   ;;  %v2309_v7 = vld [vmem:[%s3122_s2 + $0xe0] ss:$16 sps:$4 sm:$0xff]  }
  0x3c   : > { %790 = vmatprep.subr.bf16.mxu1 %v2249_v24  ;;  %v2282_v9 = vld [vmem:[%s3122_s2 + $0x48] ss:$16 sps:$4 sm:$0xff]   ;;  %v2290_v10 = vld [vmem:[%s3122_s2 + $0x6c] ss:$16 sps:$4 sm:$0xff]   ;;  %v2317_v20 = vld [vmem:[%s3126_s6 + $0x4] ss:$16 sps:$4 sm:$0xff]  }
  0x3d   : > { %2160 = vmatpush3.bf16.msra.mxu0 %v2216_v19  ;;  %v2288_v11 = vld [vmem:[%s3122_s2 + $0x68] ss:$16 sps:$4 sm:$0xff]   ;;  %v2296_v12 = vld [vmem:[%s3122_s2 + $0x8c] ss:$16 sps:$4 sm:$0xff]   ;;  %v2315_v23 = vld [vmem:[%s3126_s6] ss:$16 sps:$4 sm:$0xff]  }
  0x3e   : > { %2161 = vmatprep.subr.bf16.mxu0 %v2479_v6  ;;  %v2294_v13 = vld [vmem:[%s3122_s2 + $0x88] ss:$16 sps:$4 sm:$0xff]   ;;  %v2302_v14 = vld [vmem:[%s3122_s2 + $0xac] ss:$16 sps:$4 sm:$0xff]   ;;  %v2335_v37 = vld [vmem:[%s3126_s6 + $0x64] ss:$16 sps:$4 sm:$0xff]  }
  0x3f   : > { %791 = vmatpush1.bf16.msra.mxu1 %v2251_v27  ;;  %v2300_v15 = vld [vmem:[%s3122_s2 + $0xa8] ss:$16 sps:$4 sm:$0xff]   ;;  %v2308_v16 = vld [vmem:[%s3122_s2 + $0xcc] ss:$16 sps:$4 sm:$0xff]   ;;  %v2323_v27 = vld [vmem:[%s3126_s6 + $0x24] ss:$16 sps:$4 sm:$0xff]  }
  0x40   : > { %792 = vmatprep.subr.bf16.mxu1 %v2255_v29  ;;  %v2306_v17 = vld [vmem:[%s3122_s2 + $0xc8] ss:$16 sps:$4 sm:$0xff]   ;;  %v2314_v18 = vld [vmem:[%s3122_s2 + $0xec] ss:$16 sps:$4 sm:$0xff]  }
  0x41   : > { %2162 = vmatpush3.bf16.msra.mxu0 %v2217_v22  ;;  %v2312_v19 = vld [vmem:[%s3122_s2 + $0xe8] ss:$16 sps:$4 sm:$0xff]   ;;  %v2320_v21 = vld [vmem:[%s3126_s6 + $0xc] ss:$16 sps:$4 sm:$0xff]  }
  0x42   : > { %2163 = vmatprep.subr.bf16.mxu0 %v2479_v6  ;;  %v2318_v24 = vld [vmem:[%s3126_s6 + $0x8] ss:$16 sps:$4 sm:$0xff]  }
  0x43   : > { %793 = vmatpush1.bf16.msra.mxu1 %v2257_v32  ;;  %v2324_v32 = vld [vmem:[%s3126_s6 + $0x28] ss:$16 sps:$4 sm:$0xff]  }
  0x44   : > { %794 = vmatprep.subr.bf16.mxu1 %v2261_v33  ;;  %v2329_v33 = vld [vmem:[%s3126_s6 + $0x44] ss:$16 sps:$4 sm:$0xff]  }
  0x45   : > { %2164 = vmatpush3.bf16.msra.mxu0 %v2218_v25 }
  0x46   : > { %821 = vmatprep.subr.bf16.mxu0 %v2224_v26 }
  0x47   : > { %795 = vmatpush1.bf16.msra.mxu1 %v2263_v36  ;;  %v2330_v36 = vld [vmem:[%s3126_s6 + $0x48] ss:$16 sps:$4 sm:$0xff]  }
  0x48   : > { %2166 = vmatmul.mubr.bf16.vlgmr.msra.gmra.mrb[0].mxu0 %v448_v28  ;;  %1022 = vmatprep.subr.bf16.mxu1 %v2269_v38  ;;  %v2326_v28 = vld [vmem:[%s3126_s6 + $0x2c] ss:$16 sps:$4 sm:$0xff]  }
  0x49   : > { %822 = vmatpush1.bf16.msra.mxu0 %v2222_v30  ;;  %853 = vmatprep.mubr.bf16.mxu0 %v2481_v8  ;;  %v2338_v38 = vld [vmem:[%s3126_s6 + $0x6c] ss:$16 sps:$4 sm:$0xff]  }
  0x4a   : > { %823 = vmatprep.subr.bf16.mxu0 %v2230_v31  ;;  %813 = vmatmul.mubr.bf16.vlgmr.msra.gmra.mrb[0].mxu1 %v587_v41  ;;  %v2321_v31 = vld [vmem:[%s3126_s6 + $0x20] ss:$16 sps:$4 sm:$0xff]  }
  0x4b   : > { %1023 = vmatpush1.bf16.msra.mxu1 %v2267_v42  ;;  %1054 = vmatprep.mubr.bf16.mxu1 %v2481_v8  ;;  %v2333_v42 = vld [vmem:[%s3126_s6 + $0x60] ss:$16 sps:$4 sm:$0xff]  }
  0x4c   : > { %1024 = vmatprep.subr.bf16.mxu1 %v2275_v43  ;;  %v2336_v43 = vld [vmem:[%s3126_s6 + $0x68] ss:$16 sps:$4 sm:$0xff]  }
  0x4d   : > { %824 = vmatpush1.bf16.msra.mxu0 %v2228_v34  ;;  %v2332_v34 = vld [vmem:[%s3126_s6 + $0x4c] ss:$16 sps:$4 sm:$0xff]  }
  0x4e   : > { %825 = vmatprep.subr.bf16.mxu0 %v2236_v35  ;;  %v2327_v35 = vld [vmem:[%s3126_s6 + $0x40] ss:$16 sps:$4 sm:$0xff]  }
  0x4f   : > { %1025 = vmatpush1.bf16.msra.mxu1 %v2273_v46 }
  0x50   : > { %1026 = vmatprep.subr.bf16.mxu1 %v2281_v47 }
  0x51   : > { %826 = vmatpush1.bf16.msra.mxu0 %v2234_v39 }
  0x52   : > { %827 = vmatprep.subr.bf16.mxu0 %v2242_v40 }
  0x53   : > { %1027 = vmatpush1.bf16.msra.mxu1 %v2279_v51  ;;  %v2344_v51 = vld [vmem:[%s3126_s6 + $0x8c] ss:$16 sps:$4 sm:$0xff]  }
  0x54   : > { %1028 = vmatprep.subr.bf16.mxu1 %v2287_v53  ;;  %v2347_v53 = vld [vmem:[%s3126_s6 + $0xa4] ss:$16 sps:$4 sm:$0xff]  }
  0x55   : > { %828 = vmatpush1.bf16.msra.mxu0 %v2240_v44 }
  0x56   : > { %829 = vmatprep.subr.bf16.mxu0 %v2248_v45 }
  0x57   : > { %1029 = vmatpush1.bf16.msra.mxu1 %v2285_v54  ;;  %v2345_v54 = vld [vmem:[%s3126_s6 + $0xa0] ss:$16 sps:$4 sm:$0xff]  }
  0x58   : > { %1030 = vmatprep.subr.bf16.mxu1 %v2293_v55  ;;  %v2350_v55 = vld [vmem:[%s3126_s6 + $0xac] ss:$16 sps:$4 sm:$0xff]  }
  0x59   : > { %830 = vmatpush1.bf16.msra.mxu0 %v2246_v48 }
  0x5a   : > { %831 = vmatprep.subr.bf16.mxu0 %v2254_v49  ;;  %v2341_v49 = vld [vmem:[%s3126_s6 + $0x84] ss:$16 sps:$4 sm:$0xff]  }
  0x5b   : > { %1031 = vmatpush1.bf16.msra.mxu1 %v2291_v58  ;;  %v2351_v58 = vld [vmem:[%s3126_s6 + $0xc0] ss:$16 sps:$4 sm:$0xff]  }
  0x5c   : > { %1032 = vmatprep.subr.bf16.mxu1 %v2299_v59  ;;  %v2356_v59 = vld [vmem:[%s3126_s6 + $0xcc] ss:$16 sps:$4 sm:$0xff]  }
  0x5d   : > { %832 = vmatpush1.bf16.msra.mxu0 %v2252_v50  ;;  %v2339_v50 = vld [vmem:[%s3126_s6 + $0x80] ss:$16 sps:$4 sm:$0xff]  }
  0x5e   : > { %833 = vmatprep.subr.bf16.mxu0 %v2260_v52  ;;  %v2342_v52 = vld [vmem:[%s3126_s6 + $0x88] ss:$16 sps:$4 sm:$0xff]  }
  0x5f   : > { %1033 = vmatpush1.bf16.msra.mxu1 %v2297_v62  ;;  %v2357_v62 = vld [vmem:[%s3126_s6 + $0xe0] ss:$16 sps:$4 sm:$0xff]  }
  0x60   : > { %1034 = vmatprep.subr.bf16.mxu1 %v2305_v63  ;;  %v2362_v63 = vld [vmem:[%s3126_s6 + $0xec] ss:$16 sps:$4 sm:$0xff]  }
  0x61   : > { %834 = vmatpush1.bf16.msra.mxu0 %v2258_v56  ;;  %v2348_v56 = vld [vmem:[%s3126_s6 + $0xa8] ss:$16 sps:$4 sm:$0xff]  }
  0x62   : > { %835 = vmatprep.subr.bf16.mxu0 %v2266_v57  ;;  %v2353_v57 = vld [vmem:[%s3126_s6 + $0xc4] ss:$16 sps:$4 sm:$0xff]  }
  0x63   : > { %1035 = vmatpush1.bf16.msra.mxu1 %v2303_v2 }
  0x64   : > { %1036 = vmatprep.subr.bf16.mxu1 %v2311_v3  ;;  %v2365_v3 = vld [vmem:[%s3125_s5 + $0x4] ss:$16 sps:$4 sm:$0xff]  }
  0x65   : > { %836 = vmatpush1.bf16.msra.mxu0 %v2264_v60  ;;  %v2354_v60 = vld [vmem:[%s3126_s6 + $0xc8] ss:$16 sps:$4 sm:$0xff]  }
  0x66   : > { %1063 = vmatprep.subr.bf16.mxu0 %v2272_v61  ;;  %v2359_v61 = vld [vmem:[%s3126_s6 + $0xe4] ss:$16 sps:$4 sm:$0xff]  }
  0x67   : > { %1037 = vmatpush1.bf16.msra.mxu1 %v2309_v7  ;;  %v2366_v7 = vld [vmem:[%s3125_s5 + $0x8] ss:$16 sps:$4 sm:$0xff]  }
  0x68   : > { %854 = vmatmul.mubr.bf16.vlgmr.msra.gmra.mrb[4].mxu0 %v587_v41  ;;  %1383 = vmatprep.subr.bf16.mxu1 %v2317_v20  ;;  %v2389_v20 = vld [vmem:[%s3125_s5 + $0x84] ss:$16 sps:$4 sm:$0xff]  }
  0x69   : > { %1064 = vmatpush1.bf16.msra.mxu0 %v2270_v0  ;;  %1095 = vmatprep.mubr.bf16.mxu0 %v2481_v8  ;;  %v2360_v0 = vld [vmem:[%s3126_s6 + $0xe8] ss:$16 sps:$4 sm:$0xff]  }
  0x6a   : > { %1065 = vmatprep.subr.bf16.mxu0 %v2278_v1  ;;  %v1189_v1 = vld [vmem:[#allocation2 + $0x8] sm:$0xff] }
  0x6b   : > { %v1190_v2 = vpack.c.bf16 %v1189_v1, %v1189_v1 }
  0x6d   : > { %1066 = vmatpush1.bf16.msra.mxu0 %v2276_v4  ;;  %v2368_v4 = vld [vmem:[%s3125_s5 + $0xc] ss:$16 sps:$4 sm:$0xff]  }
  0x6e   : > { %1067 = vmatprep.subr.bf16.mxu0 %v2284_v5  ;;  %v2363_v5 = vld [vmem:[%s3125_s5] ss:$16 sps:$4 sm:$0xff]  }
  0x71   : > { %1068 = vmatpush1.bf16.msra.mxu0 %v2282_v9  ;;  %v2371_v9 = vld [vmem:[%s3125_s5 + $0x24] ss:$16 sps:$4 sm:$0xff]  }
  0x72   : > { %1069 = vmatprep.subr.bf16.mxu0 %v2290_v10  ;;  %v2374_v10 = vld [vmem:[%s3125_s5 + $0x2c] ss:$16 sps:$4 sm:$0xff]  }
  0x75   : > { %1070 = vmatpush1.bf16.msra.mxu0 %v2288_v11  ;;  %v2369_v11 = vld [vmem:[%s3125_s5 + $0x20] ss:$16 sps:$4 sm:$0xff]  }
  0x76   : > { %1071 = vmatprep.subr.bf16.mxu0 %v2296_v12  ;;  %v2372_v12 = vld [vmem:[%s3125_s5 + $0x28] ss:$16 sps:$4 sm:$0xff]  }
  0x79   : > { %1072 = vmatpush1.bf16.msra.mxu0 %v2294_v13  ;;  %v2377_v13 = vld [vmem:[%s3125_s5 + $0x44] ss:$16 sps:$4 sm:$0xff]  }
  0x7a   : > { %1073 = vmatprep.subr.bf16.mxu0 %v2302_v14  ;;  %v2375_v14 = vld [vmem:[%s3125_s5 + $0x40] ss:$16 sps:$4 sm:$0xff]  }
  0x7d   : > { %1074 = vmatpush1.bf16.msra.mxu0 %v2300_v15  ;;  %v2378_v15 = vld [vmem:[%s3125_s5 + $0x48] ss:$16 sps:$4 sm:$0xff]  }
  0x7e   : > { %1075 = vmatprep.subr.bf16.mxu0 %v2308_v16  ;;  %v2383_v16 = vld [vmem:[%s3125_s5 + $0x64] ss:$16 sps:$4 sm:$0xff]  }
  0x81   : > { %1076 = vmatpush1.bf16.msra.mxu0 %v2306_v17  ;;  %v2386_v17 = vld [vmem:[%s3125_s5 + $0x6c] ss:$16 sps:$4 sm:$0xff]  }
  0x82   : > { %1077 = vmatprep.subr.bf16.mxu0 %v2314_v18  ;;  %v2381_v18 = vld [vmem:[%s3125_s5 + $0x60] ss:$16 sps:$4 sm:$0xff]  }
  0x85   : > { %1078 = vmatpush1.bf16.msra.mxu0 %v2312_v19  ;;  %v2384_v19 = vld [vmem:[%s3125_s5 + $0x68] ss:$16 sps:$4 sm:$0xff]  }
  0x86   : > { %1424 = vmatprep.subr.bf16.mxu0 %v2320_v21  ;;  %v2392_v21 = vld [vmem:[%s3125_s5 + $0x8c] ss:$16 sps:$4 sm:$0xff]  }
 0x11b   : > { %v547_v22 = vpop.f32.mrb[0].mxu0 }
 0x11c   : > { %v553_v25 = vpack.c.bf16 %v547_v22, %v547_v22  ;;  %v2167_v26 = vpop.f32.mrb[1].mxu0  ;;  %v2387_v22 = vld [vmem:[%s3125_s5 + $0x80] ss:$16 sps:$4 sm:$0xff]  }
 0x11d   : > { %v550_v29 = vpop.f32.mrb[2].mxu0  ;;  %v2879_v39 = vpop.f32.mrb[0].mxu1  ;;  %v2398_v26 = vld [vmem:[%s3125_s5 + $0xac] ss:$16 sps:$4 sm:$0xff]  }
 0x11e   : > { %v2168_v30 = vpop.f32.mrb[3].mxu0  ;;  %1055 = vmatmul.mubr.bf16.vlgmr.msra.gmra.mrb[4].mxu1 %v553_v25  ;;  %1096 = vmatmul.mubr.bf16.vlgmr.msra.gmra.mrb[8].mxu0 %v553_v25  ;;  %v2881_v40 = vpop.f32.mrb[1].mxu1  ;;  %v2393_v25 = vld [vmem:[%s3125_s5 + $0xa0] ss:$16 sps:$4 sm:$0xff]   ;;  %v2404_v29 = vld [vmem:[%s3125_s5 + $0xcc] ss:$16 sps:$4 sm:$0xff]  }
 0x11f   : > { %1384 = vmatpush1.bf16.msra.mxu1 %v2315_v23  ;;  %1425 = vmatpush1.bf16.msra.mxu0 %v2318_v24  ;;  %v818_v41 = vpop.f32.mrb[2].mxu1  ;;  %v2390_v23 = vld [vmem:[%s3125_s5 + $0x88] ss:$16 sps:$4 sm:$0xff]   ;;  %v2395_v24 = vld [vmem:[%s3125_s5 + $0xa4] ss:$16 sps:$4 sm:$0xff]  }
 0x120   : > { %1385 = vmatprep.subr.bf16.mxu1 %v2323_v27  ;;  %1426 = vmatprep.subr.bf16.mxu0 %v2326_v28  ;;  %v819_v44 = vpop.f32.mrb[3].mxu1  ;;  %v2396_v27 = vld [vmem:[%s3125_s5 + $0xa8] ss:$16 sps:$4 sm:$0xff]   ;;  %v2401_v28 = vld [vmem:[%s3125_s5 + $0xc4] ss:$16 sps:$4 sm:$0xff]  }
 0x121   : > { %1415 = vmatprep.mubr.bf16.mxu1 %v2481_v8  ;;  %1456 = vmatprep.mubr.bf16.mxu0 %v2481_v8  ;;  %v2399_v30 = vld [vmem:[%s3125_s5 + $0xc0] ss:$16 sps:$4 sm:$0xff]  }
 0x122   : > { %v1104_v41 = vld [vmem:[%s3124_s4] sm:$0xf] }
 0x123   : > { %1386 = vmatpush1.bf16.msra.mxu1 %v2321_v31  ;;  %1427 = vmatpush1.bf16.msra.mxu0 %v2324_v32  ;;  %v2402_v31 = vld [vmem:[%s3125_s5 + $0xc8] ss:$16 sps:$4 sm:$0xff]   ;;  %v2407_v32 = vld [vmem:[%s3125_s5 + $0xe4] ss:$16 sps:$4 sm:$0xff]  }
 0x124   : > { %1387 = vmatprep.subr.bf16.mxu1 %v2329_v33  ;;  %1428 = vmatprep.subr.bf16.mxu0 %v2332_v34  ;;  %v2410_v33 = vld [vmem:[%s3125_s5 + $0xec] ss:$16 sps:$4 sm:$0xff]   ;;  %v2405_v34 = vld [vmem:[%s3125_s5 + $0xe0] ss:$16 sps:$4 sm:$0xff]  }
 0x127   : > { %1388 = vmatpush1.bf16.msra.mxu1 %v2327_v35  ;;  %1429 = vmatpush1.bf16.msra.mxu0 %v2330_v36  ;;  %v2408_v35 = vld [vmem:[%s3125_s5 + $0xe8] ss:$16 sps:$4 sm:$0xff]   ;;  %v1106_v36 = vlaneseq }
 0x128   : > { %1389 = vmatprep.subr.bf16.mxu1 %v2335_v37  ;;  %1430 = vmatprep.subr.bf16.mxu0 %v2338_v38 }
 0x129   : > { %v3041_v37 = vshrl.u32 %v1106_v36, 7 }
 0x12b   : > { %1390 = vmatpush1.bf16.msra.mxu1 %v2333_v42  ;;  %1431 = vmatpush1.bf16.msra.mxu0 %v2336_v43  ;;  %v1108_v38 = vsub.s32 0, %v3041_v37  ;;  %v1112_v42 = vsub.s32 1, %v3041_v37 }
 0x12c   : > { %1391 = vmatprep.subr.bf16.mxu1 %v2341_v49  ;;  %1432 = vmatprep.subr.bf16.mxu0 %v2344_v51 }
 0x12d   : > { %v1109_v43 = vrot.slane %v1104_v41, %v1108_v38 }
 0x12f   : > { %1392 = vmatpush1.bf16.msra.mxu1 %v2339_v50  ;;  %1433 = vmatpush1.bf16.msra.mxu0 %v2342_v52 }
 0x130   : > { %1393 = vmatprep.subr.bf16.mxu1 %v2347_v53  ;;  %1434 = vmatprep.subr.bf16.mxu0 %v2350_v55  ;;  %v1120_v55 = vsub.s32 3, %v3041_v37 }
 0x133   : > { %1394 = vmatpush1.bf16.msra.mxu1 %v2345_v54  ;;  %1435 = vmatpush1.bf16.msra.mxu0 %v2348_v56 }
 0x134   : > { %1395 = vmatprep.subr.bf16.mxu1 %v2353_v57  ;;  %1436 = vmatprep.subr.bf16.mxu0 %v2356_v59 }
 0x137   : > { %1396 = vmatpush1.bf16.msra.mxu1 %v2351_v58  ;;  %1437 = vmatpush1.bf16.msra.mxu0 %v2354_v60 }
 0x138   : > { %1397 = vmatprep.subr.bf16.mxu1 %v2359_v61  ;;  %1438 = vmatprep.subr.bf16.mxu0 %v2362_v63 }
 0x13b   : > { %v2889_v45 = vpop.f32.mrb[4].mxu0  ;;  %1398 = vmatpush1.bf16.msra.mxu1 %v2357_v62  ;;  %1439 = vmatpush1.bf16.msra.mxu0 %v2360_v0 }
 0x13c   : > { %v2891_v46 = vpop.f32.mrb[5].mxu0  ;;  %1625 = vmatprep.subr.bf16.mxu1 %v2365_v3  ;;  %1666 = vmatprep.subr.bf16.mxu0 %v2368_v4 }
 0x13d   : > { %v859_v47 = vpop.f32.mrb[6].mxu0 }
 0x13e   : > { %v860_v48 = vpop.f32.mrb[7].mxu0  ;;  %1416 = vmatmul.mubr.bf16.vlgmr.msra.gmra.mrb[8].mxu1 %v1190_v2  ;;  %1457 = vmatmul.mubr.bf16.vlgmr.msra.gmra.mrb[12].mxu0 %v1190_v2 }
 0x13f   : > { %1657 = vmatprep.mubr.bf16.mxu1 %v2481_v8  ;;  %1626 = vmatpush1.bf16.msra.mxu1 %v2363_v5  ;;  %v1113_v48 = vrot.slane %v1104_v41, %v1112_v42 }
 0x140   : > { %1667 = vmatpush1.bf16.msra.mxu0 %v2366_v7  ;;  %1698 = vmatprep.mubr.bf16.mxu0 %v2481_v8  ;;  %v2380_v8 = vld [vmem:[%s3125_s5 + $0x4c] ss:$16 sps:$4 sm:$0xff]  }
 0x141   : > { %1627 = vmatprep.subr.bf16.mxu1 %v2371_v9  ;;  %1668 = vmatprep.subr.bf16.mxu0 %v2374_v10  ;;  %v1130_v10 = vld [vmem:[#allocation3] sm:$0xff] }
 0x143   : > { %1628 = vmatpush1.bf16.msra.mxu1 %v2369_v11 }
 0x144   : > { %1669 = vmatpush1.bf16.msra.mxu0 %v2372_v12  ;;  %1629 = vmatprep.subr.bf16.mxu1 %v2377_v13 }
 0x145   : > { %1670 = vmatprep.subr.bf16.mxu0 %v2380_v8 }
 0x147   : > { %1630 = vmatpush1.bf16.msra.mxu1 %v2375_v14 }
 0x148   : > { %1671 = vmatpush1.bf16.msra.mxu0 %v2378_v15  ;;  %1631 = vmatprep.subr.bf16.mxu1 %v2383_v16 }
 0x149   : > { %1672 = vmatprep.subr.bf16.mxu0 %v2386_v17 }
 0x14b   : > { %1632 = vmatpush1.bf16.msra.mxu1 %v2381_v18 }
 0x14c   : > { %1673 = vmatpush1.bf16.msra.mxu0 %v2384_v19  ;;  %1633 = vmatprep.subr.bf16.mxu1 %v2389_v20 }
 0x14d   : > { %1674 = vmatprep.subr.bf16.mxu0 %v2392_v21 }
 0x14f   : > { %1634 = vmatpush1.bf16.msra.mxu1 %v2387_v22 }
 0x150   : > { %1675 = vmatpush1.bf16.msra.mxu0 %v2390_v23  ;;  %1635 = vmatprep.subr.bf16.mxu1 %v2395_v24 }
 0x151   : > { %1676 = vmatprep.subr.bf16.mxu0 %v2398_v26 }
 0x153   : > { %1636 = vmatpush1.bf16.msra.mxu1 %v2393_v25 }
 0x154   : > { %1677 = vmatpush1.bf16.msra.mxu0 %v2396_v27  ;;  %1637 = vmatprep.subr.bf16.mxu1 %v2401_v28  ;;  %v2411_v28 = vld [vmem:[%s3128_s8] sm:$0xff]  }
 0x155   : > { %1678 = vmatprep.subr.bf16.mxu0 %v2404_v29  ;;  %v2412_v29 = vld [vmem:[%s3128_s8 + $0x8] sm:$0xff]  }
 0x157   : > { %1638 = vmatpush1.bf16.msra.mxu1 %v2399_v30  ;;  %v2413_v30 = vld [vmem:[%s3128_s8 + $0x10] sm:$0xff]  }
 0x158   : > { %1679 = vmatpush1.bf16.msra.mxu0 %v2402_v31  ;;  %1639 = vmatprep.subr.bf16.mxu1 %v2407_v32  ;;  %v2414_v31 = vld [vmem:[%s3128_s8 + $0x18] sm:$0xff]   ;;  %v2415_v32 = vld [vmem:[%s3128_s8 + $0x20] sm:$0xff]  }
 0x159   : > { %1680 = vmatprep.subr.bf16.mxu0 %v2410_v33  ;;  %v2416_v33 = vld [vmem:[%s3128_s8 + $0x28] sm:$0xff]  }
 0x15b   : > { %1640 = vmatpush1.bf16.msra.mxu1 %v2405_v34  ;;  %v2417_v34 = vld [vmem:[%s3128_s8 + $0x30] sm:$0xff]  }
 0x15c   : > { %1681 = vmatpush1.bf16.msra.mxu0 %v2408_v35  ;;  %2169 = vmatprep.subr.bf16.mxu1 %v2479_v6  ;;  %v2418_v35 = vld [vmem:[%s3128_s8 + $0x38] sm:$0xff]  }
 0x1f1   : > { %v1056_v44 = vpop.f32.mrb[4].mxu1  ;;  %v1097_v47 = vpop.f32.mrb[8].mxu0 }
 0x1f2   : > { %v1057_v49 = vadd.f32 %v1056_v44, %v2879_v39  ;;  %v1098_v50 = vadd.f32 %v1097_v47, %v2889_v45  ;;  %v1058_v51 = vpop.f32.mrb[5].mxu1  ;;  %v1099_v52 = vpop.f32.mrb[9].mxu0  ;;  %v1121_v39 = vrot.slane %v1104_v41, %v1120_v55  ;;  %v1116_v45 = vsub.s32 2, %v3041_v37 }
 0x1f3   : > { %v1059_v53 = vadd.f32 %v1058_v51, %v2881_v40  ;;  %v1100_v54 = vadd.f32 %v1099_v52, %v2891_v46  ;;  %v1060_v56 = vpop.f32.mrb[6].mxu1  ;;  %v1101_v57 = vpop.f32.mrb[10].mxu0 }
 0x1f4   : > { %v1126_v58 = vadd.f32 %v1109_v43, %v1057_v49  ;;  %v1061_v59 = vpop.f32.mrb[7].mxu1  ;;  %v1102_v60 = vpop.f32.mrb[11].mxu0  ;;  %v1117_v46 = vrot.slane %v1104_v41, %v1116_v45  ;;  %v1707_v41 = vld [vmem:[%s3127_s7] sm:$0xf] }
 0x1f5   : > { %v1127_v61 = vadd.f32 %v1113_v48, %v1059_v53  ;;  %v1129_v40 = vadd.f32 %v1121_v39, %v1100_v54  ;;  %v1712_v43 = vrot.slane %v1707_v41, %v1108_v38  ;;  %v1716_v48 = vrot.slane %v1707_v41, %v1112_v42 }
 0x1f6   : > { %v2047_v62 = vmul.f32 -1.442695, %v1126_v58  ;;  %v1128_v1 = vadd.f32 %v1117_v46, %v1098_v50  ;;  %v1724_v38 = vrot.slane %v1707_v41, %v1120_v55  ;;  %v1720_v39 = vrot.slane %v1707_v41, %v1116_v45 }
 0x1f7   : > { %v2048_v63 = vmul.f32 -1.442695, %v1127_v61  ;;  %v2049_v0 = vmul.f32 -1.442695, %v1129_v40 }
 0x1f8   : > { %2419 = vpow2.f32 %v2047_v62 }
 0x1f9   : > { %2421 = vpow2.f32 %v2048_v63 }
 0x1fa   : > { %2423 = vpow2.f32 %v2049_v0 }
 0x1fb   : > { %2425 = vtanh.f32 %v1128_v1 }
 0x202   : > { %v2420_v2 = vpop.eup %2419 }
 0x203   : > { %v2422_v3 = vpop.eup %2421  ;;  %v1134_v4 = vadd.f32 1.0, %v2420_v2 }
 0x204   : > { %v1140_v5 = vadd.f32 1.0, %v2422_v3  ;;  %v2424_v7 = vpop.eup %2423 }
 0x205   : > { %2427 = vrcp.f32 %v1134_v4  ;;  %v2426_v9 = vpop.eup %2425  ;;  %v1147_v8 = vadd.f32 1.0, %v2424_v7  ;;  %v1734_v7 = vld [vmem:[#allocation3 + $0x8] sm:$0xff] }
 0x206   : > { %2429 = vrcp.f32 %v1140_v5 }
 0x207   : > { %2431 = vrcp.f32 %v1147_v8 }
 0x20f   : > { %v2428_v11 = vpop.eup %2427 }
 0x210   : > { %v2430_v12 = vpop.eup %2429  ;;  %v1151_v13 = vmul.f32 %v2428_v11, %v2426_v9 }
 0x211   : > { %v1150_v14 = vmul.f32 %v2430_v12, %v1130_v10  ;;  %v2432_v16 = vpop.eup %2431  ;;  %v1417_v20 = vpop.f32.mrb[8].mxu1 }
 0x212   : > { %v1419_v21 = vpop.f32.mrb[9].mxu1  ;;  %v1458_v24 = vpop.f32.mrb[12].mxu0 }
 0x213   : > { %v1152_v15 = vadd.f32 %v1151_v13, %v1150_v14  ;;  %v1421_v22 = vpop.f32.mrb[10].mxu1  ;;  %v1460_v25 = vpop.f32.mrb[13].mxu0 }
 0x214   : > { %v1422_v23 = vpop.f32.mrb[11].mxu1  ;;  %v1462_v26 = vpop.f32.mrb[14].mxu0 }
 0x215   : > { %1761 = vst [vmem:[#allocation3] sm:$0xff] %v1152_v15  ;;  %2433 = vtanh.f32 %v1152_v15  ;;  %v1463_v27 = vpop.f32.mrb[15].mxu0  ;;  %v2117_v15 = vld [vmem:[%s3129_s9] ss:$0 sm:$0xff] }
 0x21f   : > { %v2434_v17 = vpop.eup %2433 }
 0x220   : > { %v1154_v18 = vmul.f32 %v2434_v17, %v2432_v16 }
 0x222   : > { %v1155_v19 = vpack.c.bf16 %v1154_v18, %v1154_v18  ;;  %1759 = vst [vmem:[#allocation2] sm:$0xff] %v1154_v18 }
 0x224   : > { %1658 = vmatmul.mubr.bf16.vlgmr.msra.gmra.mrb[12].mxu1 %v1155_v19  ;;  %1699 = vmatmul.mubr.bf16.vlgmr.msra.gmra.mrb[16].mxu0 %v1155_v19 }
 0x225   : > { %2185 = vmatprep.mubr.msk.bf16.mxu1 %vm2480_vm0, %v2479_v6  ;;  %2170 = vmatpush3.bf16.msra.mxu1 %v2411_v28 }
 0x226   : > { %2171 = vmatprep.subr.bf16.mxu1 %v2479_v6 }
 0x229   : > { %2172 = vmatpush3.bf16.msra.mxu1 %v2412_v29 }
 0x22a   : > { %2173 = vmatprep.subr.bf16.mxu1 %v2479_v6 }
 0x22d   : > { %2174 = vmatpush3.bf16.msra.mxu1 %v2413_v30 }
 0x22e   : > { %2175 = vmatprep.subr.bf16.mxu1 %v2479_v6 }
 0x231   : > { %2176 = vmatpush3.bf16.msra.mxu1 %v2414_v31 }
 0x232   : > { %2177 = vmatprep.subr.bf16.mxu1 %v2479_v6 }
 0x235   : > { %2178 = vmatpush3.bf16.msra.mxu1 %v2415_v32 }
 0x236   : > { %2179 = vmatprep.subr.bf16.mxu1 %v2479_v6 }
 0x239   : > { %2180 = vmatpush3.bf16.msra.mxu1 %v2416_v33 }
 0x23a   : > { %2181 = vmatprep.subr.bf16.mxu1 %v2479_v6 }
 0x23d   : > { %2182 = vmatpush3.bf16.msra.mxu1 %v2417_v34 }
 0x23e   : > { %2183 = vmatprep.subr.bf16.mxu1 %v2479_v6 }
 0x241   : > { %2184 = vmatpush3.bf16.msra.mxu1 %v2418_v35  ;;  %v2128_v35 = vld [vmem:[%s1938_s21 + $0x4] sm:$0xf] }
 0x2f7   : > { %v1659_v44 = vpop.f32.mrb[12].mxu1  ;;  %v1700_v47 = vpop.f32.mrb[16].mxu0 }
 0x2f8   : > { %v1660_v49 = vadd.f32 %v1659_v44, %v1417_v20  ;;  %v1701_v50 = vadd.f32 %v1700_v47, %v1458_v24  ;;  %v1661_v51 = vpop.f32.mrb[13].mxu1  ;;  %v1702_v52 = vpop.f32.mrb[17].mxu0 }
 0x2f9   : > { %v1662_v53 = vadd.f32 %v1661_v51, %v1419_v21  ;;  %v1703_v54 = vadd.f32 %v1702_v52, %v1460_v25  ;;  %v1663_v56 = vpop.f32.mrb[14].mxu1  ;;  %v1704_v57 = vpop.f32.mrb[18].mxu0  ;;  %v1877_v21 = vand.u32 127, %v1106_v36 }
 0x2fa   : > { %v1729_v58 = vadd.f32 %v1712_v43, %v1660_v49  ;;  %v1664_v59 = vpop.f32.mrb[15].mxu1  ;;  %v1705_v60 = vpop.f32.mrb[19].mxu0  ;;  %v1731_v46 = vadd.f32 %v1720_v39, %v1701_v50 }
 0x2fb   : > { %v1730_v61 = vadd.f32 %v1716_v48, %v1662_v53  ;;  %v1732_v42 = vadd.f32 %v1724_v38, %v1703_v54 }
 0x2fc   : > { %v2114_v62 = vmul.f32 -1.442695, %v1729_v58 }
 0x2fd   : > { %v2115_v63 = vmul.f32 -1.442695, %v1730_v61  ;;  %v2116_v40 = vmul.f32 -1.442695, %v1732_v42 }
 0x2fe   : > { %2435 = vpow2.f32 %v2114_v62 }
 0x2ff   : > { %2437 = vpow2.f32 %v2115_v63 }
 0x300   : > { %2439 = vpow2.f32 %v2116_v40 }
 0x301   : > { %2441 = vtanh.f32 %v1731_v46 }
 0x308   : > { %v2436_v0 = vpop.eup %2435 }
 0x309   : > { %v2438_v1 = vpop.eup %2437  ;;  %v1738_v2 = vadd.f32 1.0, %v2436_v0 }
 0x30a   : > { %v1744_v3 = vadd.f32 1.0, %v2438_v1  ;;  %v2440_v4 = vpop.eup %2439 }
 0x30b   : > { %2443 = vrcp.f32 %v1738_v2  ;;  %v2442_v5 = vpop.eup %2441  ;;  %v1751_v11 = vadd.f32 1.0, %v2440_v4 }
 0x30c   : > { %2445 = vrcp.f32 %v1744_v3 }
 0x30d   : > { %2447 = vrcp.f32 %v1751_v11 }
 0x315   : > { %v2444_v55 = vpop.eup %2443 }
 0x316   : > { %v2446_v9 = vpop.eup %2445  ;;  %v1755_v10 = vmul.f32 %v2444_v55, %v2442_v5 }
 0x317   : > { %v1754_v12 = vmul.f32 %v2446_v9, %v1734_v7  ;;  %v2448_v45 = vpop.eup %2447 }
 0x319   : > { %v1756_v37 = vadd.f32 %v1755_v10, %v1754_v12 }
 0x31b   : > { %1762 = vst [vmem:[#allocation3 + $0x8] sm:$0xff] %v1756_v37  ;;  %2449 = vtanh.f32 %v1756_v37 }
 0x325   : > { %v2450_v13 = vpop.eup %2449 }
 0x326   : > { %v1758_v8 = vmul.f32 %v2450_v13, %v2448_v45 }
 0x328   : > { %1760 = vst [vmem:[#allocation2 + $0x8] sm:$0xff] %v1758_v8  ;;  %v1763_v14 = vpack.c.bf16 %v1758_v8, %v1758_v8 }
 0x32a   : > { %2186 = vmatmul.mubr.bf16.vlgmr.msra.gmra.mrb[16].mxu1 %v1763_v14 }
 0x3fd   : > { %v1869_v16 = vpop.f32.mrb[16].mxu1 }
 0x3fe   : > { %v1870_v17 = vadd.f32 %v2117_v15, %v1869_v16  ;;  %v2187_v18 = vpop.f32.mrb[17].mxu1 }
 0x3ff   : > { %v1872_v19 = vpop.f32.mrb[18].mxu1 }
 0x400   : > { %1875 = vst [vmem:[%s2586_s20] sm:$0xff] %v1870_v17  ;;  %1878 = vmax.xlane.f32.xlu0 %v1870_v17  ;;  %v2188_v20 = vpop.f32.mrb[19].mxu1  ;;  %s1906_s20 = scalar_select %p1901_p2, 1, 0 }
 0x402   : > { %v1907_v33 = vstv %s1906_s20 }
 0x403   : > { %vm1908_vm4 = vcmp.eq.s32.totalorder %v1907_v33, 1 }
 0x48d   : > { %v1879_v22 = vpop.xlane.xlu0 %1878 }
 0x48e   : > { %vm1880_vm1 = vcmp.eq.f32.partialorder %v1870_v17, %v1879_v22 }
 0x48f   : > { %v1881_v23 = vsel %vm1880_vm1, %v1877_v21, 128 }
 0x490   : > { %v1883_v24 = vshra.s32 %v1881_v23, 16  ;;  %v1882_v26 = vand.u32 65535, %v1881_v23 }
 0x492   : > { %v1885_v25 = vcvt.s32.f32 %v1883_v24  ;;  %v1884_v28 = vcvt.s32.f32 %v1882_v26 }
 0x494   : > { %1886 = vmin.xlane.f32.xlu0 %v1885_v25 }
 0x521   : > { %v1887_v27 = vpop.xlane.xlu0 %1886 }
 0x522   : > { %vm1888_vm2 = vcmp.eq.f32.partialorder %v1885_v25, %v1887_v27  ;;  %v1893_v30 = vcvt.f32.s32 %v1887_v27 }
 0x523   : > { %v1889_v29 = vsel %vm1888_vm2, %v1884_v28, inf }
 0x524   : > { %1890 = vmin.xlane.f32.xlu1 %v1889_v29  ;;  %v1894_v36 = vshll.u32 %v1893_v30, 16 }
 0x5b1   : > { %v1891_v31 = vpop.xlane.xlu1 %1890 }
 0x5b2   : > { %v1892_v32 = vcvt.f32.s32 %v1891_v31 }
 0x5b4   : > { %v1895_v34 = vadd.s32 %v1894_v36, %v1892_v32 }
 0x5b6   : > { %vm1896_vm3 = vcmp.eq.s32.totalorder %v1877_v21, %v1895_v34 }
 0x5b7   : > { %v2126_v41 = vsel %vm1896_vm3, 1.0, %v2479_v6 }
 0x5b8   : > { %v1899_v43 = vpack.c.bf16 %v2126_v41, %v2126_v41 }
 0x5ba   : > { %v1909_v44 = vsel %vm1908_vm4, %v2128_v35, %v1899_v43 }
 0x5bb   : > { %1910 = vst [vmem:[#allocation4] sm:$0xf] %v1909_v44 }
 0x5bc PF: > { %s24_s25 = sadd.s32 1, %s2476_s25  }
 0x5bd   : > { %p21_p3 = scmp.ge.s32.totalorder %s24_s25, 9  }
 0x5bf   :  { %23 = sbr.rel (!%p21_p3) target bundleno = 1 (0x1), region = 111 }
 0x5c6   :  { %1930 = vsyncpa [#allocation6], 1 }
 0x5c7   :  { %1932 = vsyncpa [#allocation6 + $0x1], 1 }

</bundles_post_ra>
